<compile_context>
chip_gen: v7x
topology: tpu7x:2x2x1
jax: 0.10.0
libtpu: 0.0.40
codegen_flags: <defaults>
</compile_context>

<pallas_src>
import functools

import jax
import jax.numpy as jnp
from jax.experimental import pallas as pl
from jax.experimental.pallas import tpu as pltpu


def _round_up(n, m):
    return ((n + m - 1) // m) * m


def coupling_kernel(x_ref, aux_ref, w1_ref, w2_ref, w3_ref, *rest, D, Dp, Hf):
    """Fused scale/translation MLP + affine coupling for one batch tile.

    rest = (y_ref, xpad_scratch)  when D < Dp  (ldj packed into y column D)
    rest = (y_ref, ldj_ref)       when D == Dp (separate lane-dense ldj output)
    """
    f32 = jnp.float32
    pack_ldj = D < Dp

    mask = aux_ref[0:1, 0:Dp]               # (1, Dp) f32, zero in padded cols
    b1 = aux_ref[1:2, 0:Hf]                 # fused s|t biases (f32)
    b2 = aux_ref[2:3, 0:Hf]
    b3 = aux_ref[3:4, 0:2 * Dp]

    if pack_ldj:
        y_ref, xp_ref = rest
        # Zero-pad x to lane width inside VMEM; input DMA stays (bm, D).
        # Zero every grid step so correctness does not depend on which core
        # sees program_id == 0 (cheap VPU work).
        xp_ref[...] = jnp.zeros_like(xp_ref)
        xp_ref[:, 0:D] = x_ref[...]
        x = xp_ref[...]
    else:
        y_ref, ldj_ref = rest
        x = x_ref[...]

    x_m = x * mask
    mxu = w1_ref.dtype                      # bf16 (default) or f32

    # Fused scale/translation MLPs: block-diagonal weights -> 3 wide matmuls.
    h = jnp.dot(x_m.astype(mxu), w1_ref[...], preferred_element_type=f32) + b1
    h = jnp.maximum(h, 0.0)
    h = jnp.dot(h.astype(mxu), w2_ref[...], preferred_element_type=f32) + b2
    h = jnp.maximum(h, 0.0)
    st = jnp.dot(h.astype(mxu), w3_ref[...], preferred_element_type=f32) + b3

    s_out = jnp.tanh(st[:, 0:Dp])           # padded columns are tanh(0) = 0
    t_out = st[:, Dp:2 * Dp]

    # Affine coupling (elementwise math in f32; padded y columns stay exactly 0).
    y = x_m + (1.0 - mask) * (x * jnp.exp(s_out) + t_out)

    # log|det J| = sum over feature columns of s_out (padded cols contribute 0).
    ldj = jnp.sum(s_out, axis=1, keepdims=True)

    if pack_ldj:
        # Pack ldj into the spare padded column D -> single lane-dense store.
        col = jax.lax.broadcasted_iota(jnp.int32, (1, Dp), 1)
        y_ref[...] = jnp.where(col == D, ldj, y)
    else:
        y_ref[...] = y
        ldj_ref[...] = jnp.broadcast_to(ldj, ldj_ref.shape)


def pack_coupling_params(params, mask, *, mxu_dtype=jnp.bfloat16):
    """Pad / fuse the six Linear layers + mask ONCE (call at init, not per step)."""
    f32 = jnp.float32
    D = int(mask.shape[0])
    H = int(params["ws1"].shape[1])
    Dp = _round_up(D, 128)                  # lane-aligned feature width
    Hf = _round_up(2 * H, 128)              # fused (scale ++ translation) hidden
    aux_w = max(Hf, 2 * Dp)

    w1 = jnp.zeros((Dp, Hf), f32)
    w1 = w1.at[:D, :H].set(params["ws1"]).at[:D, H:2 * H].set(params["wt1"])
    w2 = jnp.zeros((Hf, Hf), f32)
    w2 = w2.at[:H, :H].set(params["ws2"]).at[H:2 * H, H:2 * H].set(params["wt2"])
    w3 = jnp.zeros((Hf, 2 * Dp), f32)
    w3 = w3.at[:H, :D].set(params["ws3"]).at[H:2 * H, Dp:Dp + D].set(params["wt3"])

    aux = jnp.zeros((8, aux_w), f32)        # row 0: mask, rows 1..3: fused biases
    aux = aux.at[0, :D].set(mask.astype(f32))
    aux = aux.at[1, :H].set(params["bs1"][0]).at[1, H:2 * H].set(params["bt1"][0])
    aux = aux.at[2, :H].set(params["bs2"][0]).at[2, H:2 * H].set(params["bt2"][0])
    aux = aux.at[3, :D].set(params["bs3"][0]).at[3, Dp:Dp + D].set(params["bt3"][0])

    return dict(
        w1=jax.device_put(w1.astype(mxu_dtype)),
        w2=jax.device_put(w2.astype(mxu_dtype)),
        w3=jax.device_put(w3.astype(mxu_dtype)),
        aux=jax.device_put(aux),
        D=D, Dp=Dp, Hf=Hf, aux_w=aux_w,
    )


def _coupling_forward(x, aux, w1, w2, w3, *, D, Dp, Hf, aux_w, bm,
                      core_parallel, weight_buffers):
    f32 = jnp.float32
    B = x.shape[0]
    bm_eff = min(bm, B)
    Bp = _round_up(B, bm_eff)
    x = x.astype(f32)
    if Bp != B:                              # ragged batch -> pad to tile multiple
        x = jnp.pad(x, ((0, Bp - B), (0, 0)))
    grid = (Bp // bm_eff,)
    pack_ldj = D < Dp

    const = lambda i: (0, 0)

    def _wspec(shape):
        if weight_buffers is None:
            return pl.BlockSpec(shape, const)
        # Constant-index blocks never need double-buffering (v7x 64 MiB VMEM).
        return pl.BlockSpec(shape, const, pipeline_mode=pl.Buffered(weight_buffers))

    in_specs = [
        pl.BlockSpec((bm_eff, D), lambda i: (i, 0)),   # x tile at native width
        _wspec((8, aux_w)),                            # mask + fused biases
        _wspec((Dp, Hf)),                              # fused fc1
        _wspec((Hf, Hf)),                              # fused fc2 (block-diag)
        _wspec((Hf, 2 * Dp)),                          # fused fc3
    ]

    if pack_ldj:
        out_shape = jax.ShapeDtypeStruct((Bp, Dp), f32)
        out_specs = pl.BlockSpec((bm_eff, Dp), lambda i: (i, 0))
        scratch_shapes = [pltpu.VMEM((bm_eff, Dp), f32)]
    else:
        out_shape = (jax.ShapeDtypeStruct((Bp, Dp), f32),
                     jax.ShapeDtypeStruct((Bp, 128), f32))
        out_specs = (pl.BlockSpec((bm_eff, Dp), lambda i: (i, 0)),
                     pl.BlockSpec((bm_eff, 128), lambda i: (i, 0)))
        scratch_shapes = []

    # VMEM budget derived from the actual footprint (double-buffered I/O tiles,
    # single- or double-buffered constant weights) + headroom for intermediates.
    wb = w1.dtype.itemsize
    n_wbuf = 2 if weight_buffers is None else weight_buffers
    need = (2 * bm_eff * D * 4
            + 2 * bm_eff * Dp * 4
            + (0 if pack_ldj else 2 * bm_eff * 128 * 4)
            + (bm_eff * Dp * 4 if pack_ldj else 0)
            + n_wbuf * (8 * aux_w * 4 + (Dp * Hf + Hf * Hf + Hf * 2 * Dp) * wb)
            + 4 * bm_eff * max(Hf, 2 * Dp) * 4)
    vmem_limit = int(min(max(2 * need, 16 * 1024 * 1024), 64 * 1024 * 1024))

    cost = pl.CostEstimate(
        flops=2 * Bp * (Dp * Hf + Hf * Hf + Hf * 2 * Dp),
        transcendentals=2 * Bp * Dp,                   # tanh + exp
        bytes_accessed=(Bp * D + Bp * Dp + (0 if pack_ldj else Bp * 128)) * 4
        + (w1.size + w2.size + w3.size) * wb + aux.size * 4,
    )

    sem = pltpu.CORE_PARALLEL if core_parallel else "parallel"
    kernel = functools.partial(coupling_kernel, D=D, Dp=Dp, Hf=Hf)

    result = pl.pallas_call(
        kernel,
        out_shape=out_shape,
        grid_spec=pltpu.PrefetchScalarGridSpec(
            num_scalar_prefetch=0,
            grid=grid,
            in_specs=in_specs,
            out_specs=out_specs,
            scratch_shapes=scratch_shapes,
        ),
        compiler_params=pltpu.CompilerParams(
            dimension_semantics=(sem,),
            vmem_limit_bytes=vmem_limit,
        ),
        cost_estimate=cost,
    )(x, aux, w1, w2, w3)

    if pack_ldj:
        y_pad = result
        return y_pad[:B, :D], y_pad[:B, D]
    y_pad, ldj_pad = result
    return y_pad[:B, :], ldj_pad[:B, 0]


def make_coupling_layer_forward(params, mask, *, bm=512, mxu_dtype=jnp.bfloat16,
                                core_parallel=False, weight_buffers=None):
    """Pack params once; return a jitted forward(x) -> (y, log_det_jacobian).

    core_parallel=True : explicit 2-TensorCore grid split (v7x).
    weight_buffers=1   : single-buffer constant weight blocks (v7x VMEM saver).
    mxu_dtype=jnp.float32 reproduces the f32 PyTorch module's matmul policy.
    """
    packed = pack_coupling_params(params, mask, mxu_dtype=mxu_dtype)
    jitted = jax.jit(functools.partial(
        _coupling_forward,
        D=packed["D"], Dp=packed["Dp"], Hf=packed["Hf"], aux_w=packed["aux_w"],
        bm=bm, core_parallel=core_parallel, weight_buffers=weight_buffers))

    def forward(x):
        return jitted(x, packed["aux"], packed["w1"], packed["w2"], packed["w3"])

    return forward


def init_params(key, input_dim, output_dim, hid_dim):
    """Deterministic synthetic init (PyTorch-Linear-like uniform ranges)."""
    def linear(k, fan_in, fan_out):
        k1, k2 = jax.random.split(k)
        bound = 1.0 / jnp.sqrt(fan_in)
        # stored already transposed: (fan_in, fan_out)
        w = jax.random.uniform(k1, (fan_in, fan_out), jnp.float32, -bound, bound)
        b = jax.random.uniform(k2, (1, fan_out), jnp.float32, -bound, bound)
        return w, b

    keys = jax.random.split(key, 6)
    ws1, bs1 = linear(keys[0], input_dim, hid_dim)
    ws2, bs2 = linear(keys[1], hid_dim, hid_dim)
    ws3, bs3 = linear(keys[2], hid_dim, output_dim)
    wt1, bt1 = linear(keys[3], input_dim, hid_dim)
    wt2, bt2 = linear(keys[4], hid_dim, hid_dim)
    wt3, bt3 = linear(keys[5], hid_dim, output_dim)
    return dict(ws1=ws1, bs1=bs1, ws2=ws2, bs2=bs2, ws3=ws3, bs3=bs3,
                wt1=wt1, bt1=bt1, wt2=wt2, bt2=bt2, wt3=wt3, bt3=bt3)


def reference_forward(x, mask, p, mxu_dtype=jnp.float32):
    """Pure-JAX reference matching the PyTorch module; optionally emulates the
    same bf16-at-the-MXU / f32-accumulate quantization policy as the kernel."""
    def mm(a, w):
        return jnp.dot(a.astype(mxu_dtype), w.astype(mxu_dtype),
                       preferred_element_type=jnp.float32)

    x_m = x * mask
    h = jax.nn.relu(mm(x_m, p["ws1"]) + p["bs1"])
    h = jax.nn.relu(mm(h, p["ws2"]) + p["bs2"])
    s_out = jnp.tanh(mm(h, p["ws3"]) + p["bs3"])
    g = jax.nn.relu(mm(x_m, p["wt1"]) + p["bt1"])
    g = jax.nn.relu(mm(g, p["wt2"]) + p["bt2"])
    t_out = mm(g, p["wt3"]) + p["bt3"]
    y = x_m + (1.0 - mask) * (x * jnp.exp(s_out) + t_out)
    return y, s_out.sum(axis=1)


if __name__ == "__main__":
    # mask = [0, 1] in the module  =>  input_dim = output_dim = 2
    B, D, H = 256, 2, 32
    key = jax.random.PRNGKey(0)
    k_x, k_p, k_x2, k_p2 = jax.random.split(key, 4)

    x = jax.random.normal(k_x, (B, D), jnp.float32)
    mask = jnp.array([0.0, 1.0], dtype=jnp.float32)
    params = init_params(k_p, D, D, H)

    # bf16-MXU path (packing happens once, forward is one jitted dispatch).
    fwd_bf16 = make_coupling_layer_forward(params, mask, bm=512,
                                           mxu_dtype=jnp.bfloat16)
    y, ldj = fwd_bf16(x)
    y, ldj = jax.block_until_ready(y), jax.block_until_ready(ldj)
    y_ref, ldj_ref = reference_forward(x, mask, params, mxu_dtype=jnp.bfloat16)
    assert y.shape == (B, D) and ldj.shape == (B,)
    assert jnp.allclose(y, y_ref, atol=1e-4, rtol=1e-4)
    assert jnp.allclose(ldj, ldj_ref, atol=1e-4, rtol=1e-4)

    # f32-MXU path reproduces the original f32 PyTorch module semantics.
    fwd_f32 = make_coupling_layer_forward(params, mask, bm=512,
                                          mxu_dtype=jnp.float32)
    y32, ldj32 = fwd_f32(x)
    y32 = jax.block_until_ready(y32)
    y_ref32, ldj_ref32 = reference_forward(x, mask, params)
    assert jnp.allclose(y32, y_ref32, atol=1e-4, rtol=1e-4)
    assert jnp.allclose(ldj32, ldj_ref32, atol=1e-4, rtol=1e-4)

    # Ragged batch (remainder tile + multi-step grid) through the same code path.
    fwd_small = make_coupling_layer_forward(params, mask, bm=128,
                                            mxu_dtype=jnp.bfloat16)
    xr = jax.random.normal(k_x2, (293, D), jnp.float32)
    yr, ldjr = fwd_small(xr)
    yr = jax.block_until_ready(yr)
    yr_ref, ldjr_ref = reference_forward(xr, mask, params, mxu_dtype=jnp.bfloat16)
    assert yr.shape == (293, D) and ldjr.shape == (293,)
    assert jnp.allclose(yr, yr_ref, atol=1e-4, rtol=1e-4)
    assert jnp.allclose(ldjr, ldjr_ref, atol=1e-4, rtol=1e-4)

    # Lane-aligned D (D % 128 == 0): no spare-column blowup; ldj is emitted as a
    # separate lane-dense output and no in-kernel x padding is needed.
    D2, H2, B2 = 128, 64, 192
    mask2 = (jnp.arange(D2) % 2).astype(jnp.float32)
    params2 = init_params(k_p2, D2, D2, H2)
    x2 = jax.random.normal(k_x2, (B2, D2), jnp.float32)
    fwd2 = make_coupling_layer_forward(params2, mask2, bm=512,
                                       mxu_dtype=jnp.bfloat16)
    y2, ldj2 = fwd2(x2)
    y2 = jax.block_until_ready(y2)
    y2_ref, ldj2_ref = reference_forward(x2, mask2, params2,
                                         mxu_dtype=jnp.bfloat16)
    assert y2.shape == (B2, D2) and ldj2.shape == (B2,)
    assert jnp.allclose(y2, y2_ref, atol=5e-3, rtol=5e-3)
    assert jnp.allclose(ldj2, ldj2_ref, atol=5e-3, rtol=5e-3)

    print("KERNEL_OK")
</pallas_src>

<mosaic_0001>
module attributes {stable_mosaic.version = 11 : i64} {
  func.func @coupling_kernel(%arg0: i32, %arg1: memref<256x2xf32, #tpu.memory_space<vmem>>, %arg2: memref<8x256xf32, #tpu.memory_space<vmem>>, %arg3: memref<128x128xbf16, #tpu.memory_space<vmem>>, %arg4: memref<128x128xbf16, #tpu.memory_space<vmem>>, %arg5: memref<128x256xbf16, #tpu.memory_space<vmem>>, %arg6: memref<256x128xf32, #tpu.memory_space<vmem>>, %arg7: memref<256x128xf32, #tpu.memory_space<vmem>>) attributes {dimension_semantics = [#tpu.dimension_semantics<parallel>], iteration_bounds = array<i64: 1>, scalar_prefetch = 0 : i64, scratch_operands = 1 : i64, tpu.core_type = #tpu.core_type<tc>, window_params = [{transform_indices = @transform_0, window_bounds = array<i64: 256, 2>}, {pipeline_mode = #tpu.pipeline_mode<synchronous>, transform_indices = @transform_1, window_bounds = array<i64: 8, 256>}, {pipeline_mode = #tpu.pipeline_mode<synchronous>, transform_indices = @transform_2, window_bounds = array<i64: 128, 128>}, {pipeline_mode = #tpu.pipeline_mode<synchronous>, transform_indices = @transform_3, window_bounds = array<i64: 128, 128>}, {pipeline_mode = #tpu.pipeline_mode<synchronous>, transform_indices = @transform_4, window_bounds = array<i64: 128, 256>}, {transform_indices = @transform_5, window_bounds = array<i64: 256, 128>}]} {
    %c0 = arith.constant 0 : index
    %c0_0 = arith.constant 0 : index
    %0 = vector.load %arg2[%c0, %c0_0] : memref<8x256xf32, #tpu.memory_space<vmem>>, vector<1x128xf32>
    %c1 = arith.constant 1 : index
    %c0_1 = arith.constant 0 : index
    %1 = vector.load %arg2[%c1, %c0_1] : memref<8x256xf32, #tpu.memory_space<vmem>>, vector<1x128xf32>
    %c2 = arith.constant 2 : index
    %c0_2 = arith.constant 0 : index
    %2 = vector.load %arg2[%c2, %c0_2] : memref<8x256xf32, #tpu.memory_space<vmem>>, vector<1x128xf32>
    %c3 = arith.constant 3 : index
    %c0_3 = arith.constant 0 : index
    %3 = vector.load %arg2[%c3, %c0_3] : memref<8x256xf32, #tpu.memory_space<vmem>>, vector<1x256xf32>
    %cst = arith.constant 0.000000e+00 : f32
    %4 = vector.broadcast %cst : f32 to vector<256x128xf32>
    %c0_4 = arith.constant 0 : index
    %c0_5 = arith.constant 0 : index
    %5 = vector.load %arg7[%c0_4, %c0_5] : memref<256x128xf32, #tpu.memory_space<vmem>>, vector<256x128xf32>
    tpu.vector_store %arg7[%c0_4, %c0_5], %4 {strides = array<i32>} : memref<256x128xf32, #tpu.memory_space<vmem>>, vector<256x128xf32>,
    %c0_6 = arith.constant 0 : index
    %c0_7 = arith.constant 0 : index
    %6 = vector.load %arg1[%c0_6, %c0_7] : memref<256x2xf32, #tpu.memory_space<vmem>>, vector<256x2xf32>
    %c0_8 = arith.constant 0 : index
    %c0_9 = arith.constant 0 : index
    %7 = vector.load %arg7[%c0_8, %c0_9] : memref<256x128xf32, #tpu.memory_space<vmem>>, vector<256x2xf32>
    tpu.vector_store %arg7[%c0_8, %c0_9], %6 {strides = array<i32>} : memref<256x128xf32, #tpu.memory_space<vmem>>, vector<256x2xf32>,
    %c0_10 = arith.constant 0 : index
    %c0_11 = arith.constant 0 : index
    %8 = vector.load %arg7[%c0_10, %c0_11] : memref<256x128xf32, #tpu.memory_space<vmem>>, vector<256x128xf32>
    %9 = vector.broadcast %0 : vector<1x128xf32> to vector<256x128xf32>
    %10 = arith.mulf %8, %9 : vector<256x128xf32>
    %11 = arith.truncf %10 : vector<256x128xf32> to vector<256x128xbf16>
    %c0_12 = arith.constant 0 : index
    %c0_13 = arith.constant 0 : index
    %12 = vector.load %arg3[%c0_12, %c0_13] : memref<128x128xbf16, #tpu.memory_space<vmem>>, vector<128x128xbf16>
    %cst_14 = arith.constant dense<0.000000e+00> : vector<256x128xf32>
    %13 = tpu.matmul %11, %12, %cst_14 {dimension_numbers = #tpu.dot_dimension_numbers<[1], [0], [0], [1], [0, 0, 1, 1], [], []>} : vector<256x128xbf16>, vector<128x128xbf16>, vector<256x128xf32> -> vector<256x128xf32>
    %14 = vector.broadcast %1 : vector<1x128xf32> to vector<256x128xf32>
    %15 = arith.addf %13, %14 : vector<256x128xf32>
    %cst_15 = arith.constant 0.000000e+00 : f32
    %16 = vector.broadcast %cst_15 : f32 to vector<256x128xf32>
    %17 = arith.maximumf %15, %16 : vector<256x128xf32>
    %18 = arith.truncf %17 : vector<256x128xf32> to vector<256x128xbf16>
    %c0_16 = arith.constant 0 : index
    %c0_17 = arith.constant 0 : index
    %19 = vector.load %arg4[%c0_16, %c0_17] : memref<128x128xbf16, #tpu.memory_space<vmem>>, vector<128x128xbf16>
    %cst_18 = arith.constant dense<0.000000e+00> : vector<256x128xf32>
    %20 = tpu.matmul %18, %19, %cst_18 {dimension_numbers = #tpu.dot_dimension_numbers<[1], [0], [0], [1], [0, 0, 1, 1], [], []>} : vector<256x128xbf16>, vector<128x128xbf16>, vector<256x128xf32> -> vector<256x128xf32>
    %21 = vector.broadcast %2 : vector<1x128xf32> to vector<256x128xf32>
    %22 = arith.addf %20, %21 : vector<256x128xf32>
    %cst_19 = arith.constant 0.000000e+00 : f32
    %23 = vector.broadcast %cst_19 : f32 to vector<256x128xf32>
    %24 = arith.maximumf %22, %23 : vector<256x128xf32>
    %25 = arith.truncf %24 : vector<256x128xf32> to vector<256x128xbf16>
    %c0_20 = arith.constant 0 : index
    %c0_21 = arith.constant 0 : index
    %26 = vector.load %arg5[%c0_20, %c0_21] : memref<128x256xbf16, #tpu.memory_space<vmem>>, vector<128x256xbf16>
    %cst_22 = arith.constant dense<0.000000e+00> : vector<256x256xf32>
    %27 = tpu.matmul %25, %26, %cst_22 {dimension_numbers = #tpu.dot_dimension_numbers<[1], [0], [0], [1], [0, 0, 1, 1], [], []>} : vector<256x128xbf16>, vector<128x256xbf16>, vector<256x256xf32> -> vector<256x256xf32>
    %28 = vector.broadcast %3 : vector<1x256xf32> to vector<256x256xf32>
    %29 = arith.addf %27, %28 : vector<256x256xf32>
    %30 = vector.extract_strided_slice %29 {offsets = [0, 0], sizes = [256, 128], strides = [1, 1]} : vector<256x256xf32> to vector<256x128xf32>
    %31 = math.tanh %30 : vector<256x128xf32>
    %32 = vector.extract_strided_slice %29 {offsets = [0, 128], sizes = [256, 128], strides = [1, 1]} : vector<256x256xf32> to vector<256x128xf32>
    %cst_23 = arith.constant 1.000000e+00 : f32
    %33 = vector.broadcast %cst_23 : f32 to vector<1x128xf32>
    %34 = arith.subf %33, %0 : vector<1x128xf32>
    %35 = math.exp %31 : vector<256x128xf32>
    %36 = arith.mulf %8, %35 : vector<256x128xf32>
    %37 = arith.addf %36, %32 : vector<256x128xf32>
    %38 = vector.broadcast %34 : vector<1x128xf32> to vector<256x128xf32>
    %39 = arith.mulf %38, %37 : vector<256x128xf32>
    %40 = arith.addf %10, %39 : vector<256x128xf32>
    %cst_24 = arith.constant dense<0.000000e+00> : vector<256xf32>
    %41 = vector.multi_reduction <add>, %31, %cst_24 [1] : vector<256x128xf32> to vector<256xf32>
    %42 = vector.shape_cast %41 : vector<256xf32> to vector<256x1xf32>
    %43 = tpu.iota {dimensions = array<i32: 1>} : vector<1x128xi32>
    %c2_i32 = arith.constant 2 : i32
    %44 = vector.broadcast %c2_i32 : i32 to vector<1x128xi32>
    %45 = arith.cmpi eq, %43, %44 : vector<1x128xi32>
    %46 = vector.shape_cast %45 : vector<1x128xi1> to vector<1x128xi1>
    %47 = vector.broadcast %46 : vector<1x128xi1> to vector<256x128xi1>
    %48 = vector.shape_cast %42 : vector<256x1xf32> to vector<256x1xf32>
    %49 = vector.broadcast %48 : vector<256x1xf32> to vector<256x128xf32>
    %50 = arith.select %47, %49, %40 : vector<256x128xi1>, vector<256x128xf32>
    %c0_25 = arith.constant 0 : index
    %c0_26 = arith.constant 0 : index
    %51 = vector.load %arg6[%c0_25, %c0_26] : memref<256x128xf32, #tpu.memory_space<vmem>>, vector<256x128xf32>
    tpu.vector_store %arg6[%c0_25, %c0_26], %50 {strides = array<i32>} : memref<256x128xf32, #tpu.memory_space<vmem>>, vector<256x128xf32>,
    return
  }
  func.func @transform_0(%arg0: i32) -> (i32, i32) {
    %c0_i32 = arith.constant 0 : i32
    %c0_i32_0 = arith.constant 0 : i32
    return %arg0, %c0_i32 : i32, i32
  }
  func.func @transform_1(%arg0: i32) -> (i32, i32) {
    %c0_i32 = arith.constant 0 : i32
    %c0_i32_0 = arith.constant 0 : i32
    %c0_i32_1 = arith.constant 0 : i32
    return %c0_i32, %c0_i32_0 : i32, i32
  }
  func.func @transform_2(%arg0: i32) -> (i32, i32) {
    %c0_i32 = arith.constant 0 : i32
    %c0_i32_0 = arith.constant 0 : i32
    %c0_i32_1 = arith.constant 0 : i32
    return %c0_i32, %c0_i32_0 : i32, i32
  }
  func.func @transform_3(%arg0: i32) -> (i32, i32) {
    %c0_i32 = arith.constant 0 : i32
    %c0_i32_0 = arith.constant 0 : i32
    %c0_i32_1 = arith.constant 0 : i32
    return %c0_i32, %c0_i32_0 : i32, i32
  }
  func.func @transform_4(%arg0: i32) -> (i32, i32) {
    %c0_i32 = arith.constant 0 : i32
    %c0_i32_0 = arith.constant 0 : i32
    %c0_i32_1 = arith.constant 0 : i32
    return %c0_i32, %c0_i32_0 : i32, i32
  }
  func.func @transform_5(%arg0: i32) -> (i32, i32) {
    %c0_i32 = arith.constant 0 : i32
    %c0_i32_0 = arith.constant 0 : i32
    return %arg0, %c0_i32 : i32, i32
  }
}

</mosaic_0001>

<bundles_post_ra>
// kernel: _coupling_forward.1
= control target key start
LH: loop header
LB: loop body
LE: loop exit
PB: predicated region body
PF: predicated region fallthrough
CT: control target
= control target key end

     0   :  { %10 = vsyncpa [#allocation4], 0  ;;  %s1828_s18 = smov [#allocation3]   ;;  %s2793_s0 = inlined_call_operand.vmem [shape: f32[256,2], index: 0, kind: input, shape index: {}]   ;;  %s2794_s1 = inlined_call_operand.hbm [shape: f32[8,256], index: 1, kind: input, shape index: {}]   ;;  %s2795_s2 = inlined_call_operand.vmem [shape: bf16[128,128], index: 2, kind: input, shape index: {}]   ;;  %s2796_s3 = inlined_call_operand.vmem [shape: bf16[128,128], index: 3, kind: input, shape index: {}]   ;;  %s2797_s4 = inlined_call_operand.vmem [shape: bf16[128,256], index: 4, kind: input, shape index: {}]   ;;  %s2798_s5 = inlined_call_operand.vmem [shape: f32[256,128], index: 5, kind: output, shape index: {}]  }
   0x1   :  { %s19_s19 = sshll.u32 %s1828_s18, 4  ;;  %s1804_s22 = scalar_lea.hbm %s2794_s1, 256  ;;  %s20_s19 = int_to_ptr.vmem [resolvable:$true] %s19_s19 }
   0x2   :  { %p1805_p0 = scmp.ne.s32.totalorder %s2794_s1, %s1804_s22  ;;  %p1808_p1 = scmp.lt.u32.totalorder %s1804_s22, %s2794_s1 }
   0x4   :  { %p1810_p2 = pnand %p1808_p1, %p1805_p0 }
   0x6   :  { %1813 = shalt.err (!%p1810_p2)
}
   0x7   :  { %s1814_s27 = scalar_lea.vmem %s20_s19, 256  ;;  %p1819_p4 = scmp.lt.s32.totalorder %s20_s19, %s20_s19 }
   0x8   :  { %p1815_p3 = scmp.ne.s32.totalorder %s20_s19, %s1814_s27  ;;  %p1820_p5 = scmp.lt.s32.totalorder %s1814_s27, %s1814_s27 }
   0xa   :  { %p1821_p6 = por %p1820_p5, %p1819_p4 }
   0xc   :  { %p1822_p7 = pnand %p1821_p6, %p1815_p3 }
   0xe   :  { %1825 = shalt.err (!%p1822_p7)
}
   0xf   :  { %22 = dma.hbm_to_vmem [thread:$0]  %s2794_s1, 256, %s20_s19, [#allocation4]  }
  0x10   :  { %1826 = dma.done.wait [#allocation4], 256  }
  0x11   :  { %1827 = vsyncadd [#allocation4], 4294967040  ;;  %v1829_v0 = vmov 0.0   ;;  %v1603_v1 = vld [vmem:[%s2795_s2] sm:$0xff]   ;;  %v1604_v2 = vld [vmem:[%s2795_s2 + $0x8] sm:$0xff]   ;;  %vm102_vm0 = vcmask 15360  }
  0x12   :  { %38 = vst [vmem:[#allocation2] sm:$0xff] %v1829_v0  ;;  %39 = vst [vmem:[#allocation2 + $0x8] sm:$0xff] %v1829_v0  ;;  %1504 = vmatprep.subr.bf16.mxu1 %v1603_v1  ;;  %v1605_v3 = vld [vmem:[%s2795_s2 + $0x10] sm:$0xff]   ;;  %v1606_v4 = vld [vmem:[%s2795_s2 + $0x18] sm:$0xff]  }
  0x13   :  { %40 = vst [vmem:[#allocation2 + $0x10] sm:$0xff] %v1829_v0  ;;  %41 = vst [vmem:[#allocation2 + $0x18] sm:$0xff] %v1829_v0  ;;  %1505 = vmatpush3.bf16.msra.mxu1 %v1603_v1  ;;  %v70_v5 = vld [vmem:[%s2793_s0] sm:$0xff]  ;;  %v71_v6 = vld [vmem:[%s2793_s0 + $0x8] sm:$0xff] }
  0x14   :  { %42 = vst [vmem:[#allocation2 + $0x20] sm:$0xff] %v1829_v0  ;;  %43 = vst [vmem:[#allocation2 + $0x28] sm:$0xff] %v1829_v0  ;;  %1506 = vmatprep.subr.bf16.mxu1 %v1604_v2  ;;  %v72_v7 = vld [vmem:[%s2793_s0 + $0x10] sm:$0xff]  ;;  %v73_v8 = vld [vmem:[%s2793_s0 + $0x18] sm:$0xff] }
  0x15   :  { %44 = vst [vmem:[#allocation2 + $0x30] sm:$0xff] %v1829_v0  ;;  %45 = vst [vmem:[#allocation2 + $0x38] sm:$0xff] %v1829_v0  ;;  %v74_v9 = vld [vmem:[%s2793_s0 + $0x20] sm:$0xff]  ;;  %v75_v11 = vld [vmem:[%s2793_s0 + $0x28] sm:$0xff] }
  0x16   :  { %46 = vst [vmem:[#allocation2 + $0x40] sm:$0xff] %v1829_v0  ;;  %47 = vst [vmem:[#allocation2 + $0x48] sm:$0xff] %v1829_v0  ;;  %v1607_v10 = vld [vmem:[%s2795_s2 + $0x20] sm:$0xff]   ;;  %v76_v12 = vld [vmem:[%s2793_s0 + $0x30] sm:$0xff] }
  0x17   :  { %48 = vst [vmem:[#allocation2 + $0x50] sm:$0xff] %v1829_v0  ;;  %49 = vst [vmem:[#allocation2 + $0x58] sm:$0xff] %v1829_v0  ;;  %1507 = vmatpush3.bf16.msra.mxu1 %v1604_v2  ;;  %v77_v13 = vld [vmem:[%s2793_s0 + $0x38] sm:$0xff]  ;;  %v78_v14 = vld [vmem:[%s2793_s0 + $0x40] sm:$0xff] }
  0x18   :  { %50 = vst [vmem:[#allocation2 + $0x60] sm:$0xff] %v1829_v0  ;;  %51 = vst [vmem:[#allocation2 + $0x68] sm:$0xff] %v1829_v0  ;;  %1508 = vmatprep.subr.bf16.mxu1 %v1605_v3  ;;  %v79_v15 = vld [vmem:[%s2793_s0 + $0x48] sm:$0xff]  ;;  %v80_v16 = vld [vmem:[%s2793_s0 + $0x50] sm:$0xff] }
  0x19   :  { %52 = vst [vmem:[#allocation2 + $0x70] sm:$0xff] %v1829_v0  ;;  %53 = vst [vmem:[#allocation2 + $0x78] sm:$0xff] %v1829_v0  ;;  %v1929_v17 = vld [vmem:[#allocation3] ss:$0 sm:$0xff]  ;;  %v81_v18 = vld [vmem:[%s2793_s0 + $0x58] sm:$0xff] }
  0x1a   :  { %54 = vst [vmem:[#allocation2 + $0x80] sm:$0xff] %v1829_v0  ;;  %55 = vst [vmem:[#allocation2 + $0x88] sm:$0xff] %v1829_v0  ;;  %v82_v19 = vld [vmem:[%s2793_s0 + $0x60] sm:$0xff]  ;;  %v83_v20 = vld [vmem:[%s2793_s0 + $0x68] sm:$0xff] }
  0x1b   :  { %56 = vst [vmem:[#allocation2 + $0x90] sm:$0xff] %v1829_v0  ;;  %57 = vst [vmem:[#allocation2 + $0x98] sm:$0xff] %v1829_v0  ;;  %1509 = vmatpush3.bf16.msra.mxu1 %v1605_v3  ;;  %v84_v21 = vld [vmem:[%s2793_s0 + $0x70] sm:$0xff]  ;;  %v85_v22 = vld [vmem:[%s2793_s0 + $0x78] sm:$0xff] }
  0x1c   :  { %58 = vst [vmem:[#allocation2 + $0xa0] sm:$0xff] %v1829_v0  ;;  %59 = vst [vmem:[#allocation2 + $0xa8] sm:$0xff] %v1829_v0  ;;  %1510 = vmatprep.subr.bf16.mxu1 %v1606_v4  ;;  %v86_v23 = vld [vmem:[%s2793_s0 + $0x80] sm:$0xff]  ;;  %v1608_v24 = vld [vmem:[%s2795_s2 + $0x28] sm:$0xff]  }
  0x1d   :  { %60 = vst [vmem:[#allocation2 + $0xb0] sm:$0xff] %v1829_v0  ;;  %61 = vst [vmem:[#allocation2 + $0xb8] sm:$0xff] %v1829_v0  ;;  %v87_v25 = vld [vmem:[%s2793_s0 + $0x88] sm:$0xff]  ;;  %v88_v26 = vld [vmem:[%s2793_s0 + $0x90] sm:$0xff] }
  0x1e   :  { %62 = vst [vmem:[#allocation2 + $0xc0] sm:$0xff] %v1829_v0  ;;  %63 = vst [vmem:[#allocation2 + $0xc8] sm:$0xff] %v1829_v0  ;;  %v89_v27 = vld [vmem:[%s2793_s0 + $0x98] sm:$0xff]  ;;  %v90_v28 = vld [vmem:[%s2793_s0 + $0xa0] sm:$0xff] }
  0x1f   :  { %64 = vst [vmem:[#allocation2 + $0xd0] sm:$0xff] %v1829_v0  ;;  %65 = vst [vmem:[#allocation2 + $0xd8] sm:$0xff] %v1829_v0  ;;  %1511 = vmatpush3.bf16.msra.mxu1 %v1606_v4  ;;  %v91_v29 = vld [vmem:[%s2793_s0 + $0xa8] sm:$0xff]  ;;  %v92_v30 = vld [vmem:[%s2793_s0 + $0xb0] sm:$0xff] }
  0x20   :  { %66 = vst [vmem:[#allocation2 + $0xe0] sm:$0xff] %v1829_v0  ;;  %67 = vst [vmem:[#allocation2 + $0xe8] sm:$0xff] %v1829_v0  ;;  %1512 = vmatprep.subr.bf16.mxu1 %v1607_v10  ;;  %v93_v33 = vld [vmem:[%s2793_s0 + $0xb8] sm:$0xff]  ;;  %v1609_v37 = vld [vmem:[%s2795_s2 + $0x30] sm:$0xff]  }
  0x21   :  { %68 = vst [vmem:[#allocation2 + $0xf0] sm:$0xff] %v1829_v0  ;;  %69 = vst [vmem:[#allocation2 + $0xf8] sm:$0xff] %v1829_v0  ;;  %v1610_v38 = vld [vmem:[%s2795_s2 + $0x38] sm:$0xff]   ;;  %v94_v43 = vld [vmem:[%s2793_s0 + $0xc0] sm:$0xff] }
  0x22   :  { %103 = vst.msk [vmem:[#allocation2] sm:$0xff] %vm102_vm0, %v70_v5  ;;  %104 = vst.msk [vmem:[#allocation2 + $0x8] sm:$0xff] %vm102_vm0, %v71_v6  ;;  %v95_v44 = vld [vmem:[%s2793_s0 + $0xc8] sm:$0xff]  ;;  %v96_v45 = vld [vmem:[%s2793_s0 + $0xd0] sm:$0xff] }
  0x23   :  { %105 = vst.msk [vmem:[#allocation2 + $0x10] sm:$0xff] %vm102_vm0, %v72_v7  ;;  %106 = vst.msk [vmem:[#allocation2 + $0x18] sm:$0xff] %vm102_vm0, %v73_v8  ;;  %1513 = vmatpush3.bf16.msra.mxu1 %v1607_v10  ;;  %v97_v46 = vld [vmem:[%s2793_s0 + $0xd8] sm:$0xff]  ;;  %v98_v47 = vld [vmem:[%s2793_s0 + $0xe0] sm:$0xff] }
  0x24   :  { %107 = vst.msk [vmem:[#allocation2 + $0x20] sm:$0xff] %vm102_vm0, %v74_v9  ;;  %108 = vst.msk [vmem:[#allocation2 + $0x28] sm:$0xff] %vm102_vm0, %v75_v11  ;;  %1514 = vmatprep.subr.bf16.mxu1 %v1608_v24  ;;  %v99_v50 = vld [vmem:[%s2793_s0 + $0xe8] sm:$0xff]  ;;  %v100_v51 = vld [vmem:[%s2793_s0 + $0xf0] sm:$0xff] }
  0x25   :  { %109 = vst.msk [vmem:[#allocation2 + $0x30] sm:$0xff] %vm102_vm0, %v76_v12  ;;  %110 = vst.msk [vmem:[#allocation2 + $0x38] sm:$0xff] %vm102_vm0, %v77_v13  ;;  %v101_v52 = vld [vmem:[%s2793_s0 + $0xf8] sm:$0xff]  ;;  %v1611_v55 = vld [vmem:[%s2796_s3] sm:$0xff]  }
  0x26   :  { %111 = vst.msk [vmem:[#allocation2 + $0x40] sm:$0xff] %vm102_vm0, %v78_v14  ;;  %112 = vst.msk [vmem:[#allocation2 + $0x48] sm:$0xff] %vm102_vm0, %v79_v15  ;;  %v1612_v62 = vld [vmem:[%s2796_s3 + $0x8] sm:$0xff]   ;;  %v1613_v3 = vld [vmem:[%s2796_s3 + $0x10] sm:$0xff]  }
  0x27   :  { %113 = vst.msk [vmem:[#allocation2 + $0x50] sm:$0xff] %vm102_vm0, %v80_v16  ;;  %114 = vst.msk [vmem:[#allocation2 + $0x58] sm:$0xff] %vm102_vm0, %v81_v18  ;;  %1515 = vmatpush3.bf16.msra.mxu1 %v1608_v24  ;;  %v1614_v10 = vld [vmem:[%s2796_s3 + $0x18] sm:$0xff]   ;;  %v1615_v15 = vld [vmem:[%s2796_s3 + $0x20] sm:$0xff]  }
  0x28   :  { %115 = vst.msk [vmem:[#allocation2 + $0x60] sm:$0xff] %vm102_vm0, %v82_v19  ;;  %116 = vst.msk [vmem:[#allocation2 + $0x68] sm:$0xff] %vm102_vm0, %v83_v20  ;;  %1516 = vmatprep.subr.bf16.mxu1 %v1609_v37 }
  0x29   :  { %117 = vst.msk [vmem:[#allocation2 + $0x70] sm:$0xff] %vm102_vm0, %v84_v21  ;;  %118 = vst.msk [vmem:[#allocation2 + $0x78] sm:$0xff] %vm102_vm0, %v85_v22  ;;  %v135_v31 = vld [vmem:[#allocation2] sm:$0xff]  ;;  %v136_v32 = vld [vmem:[#allocation2 + $0x8] sm:$0xff] }
  0x2a   :  { %119 = vst.msk [vmem:[#allocation2 + $0x80] sm:$0xff] %vm102_vm0, %v86_v23  ;;  %120 = vst.msk [vmem:[#allocation2 + $0x88] sm:$0xff] %vm102_vm0, %v87_v25  ;;  %v1989_v34 = vmul.f32 %v135_v31, %v1929_v17  ;;  %v1992_v35 = vmul.f32 %v136_v32, %v1929_v17  ;;  %v137_v39 = vld [vmem:[#allocation2 + $0x10] sm:$0xff]  ;;  %v138_v40 = vld [vmem:[#allocation2 + $0x18] sm:$0xff] }
  0x2b   :  { %121 = vst.msk [vmem:[#allocation2 + $0x90] sm:$0xff] %vm102_vm0, %v88_v26  ;;  %122 = vst.msk [vmem:[#allocation2 + $0x98] sm:$0xff] %vm102_vm0, %v89_v27  ;;  %v139_v41 = vld [vmem:[#allocation2 + $0x20] sm:$0xff]  ;;  %v140_v42 = vld [vmem:[#allocation2 + $0x28] sm:$0xff]  ;;  %v2021_v48 = vmul.f32 %v137_v39, %v1929_v17  ;;  %v2024_v49 = vmul.f32 %v138_v40, %v1929_v17  ;;  %1517 = vmatpush3.bf16.msra.mxu1 %v1609_v37 }
  0x2c   :  { %123 = vst.msk [vmem:[#allocation2 + $0xa0] sm:$0xff] %vm102_vm0, %v90_v28  ;;  %124 = vst.msk [vmem:[#allocation2 + $0xa8] sm:$0xff] %vm102_vm0, %v91_v29  ;;  %v199_v36 = vpack.c.bf16 %v1992_v35, %v1989_v34  ;;  %v2039_v53 = vmul.f32 %v139_v41, %v1929_v17  ;;  %v2042_v54 = vmul.f32 %v140_v42, %v1929_v17  ;;  %1518 = vmatprep.subr.bf16.mxu1 %v1610_v38  ;;  %v141_v57 = vld [vmem:[#allocation2 + $0x30] sm:$0xff]  ;;  %v142_v59 = vld [vmem:[#allocation2 + $0x38] sm:$0xff] }
  0x2d   :  { %125 = vst.msk [vmem:[#allocation2 + $0xb0] sm:$0xff] %vm102_vm0, %v92_v30  ;;  %126 = vst.msk [vmem:[#allocation2 + $0xb8] sm:$0xff] %vm102_vm0, %v93_v33  ;;  %v200_v56 = vpack.c.bf16 %v2024_v49, %v2021_v48  ;;  %v143_v60 = vld [vmem:[#allocation2 + $0x40] sm:$0xff]  ;;  %v144_v61 = vld [vmem:[#allocation2 + $0x48] sm:$0xff]  ;;  %v2058_v63 = vmul.f32 %v141_v57, %v1929_v17  ;;  %v2061_v0 = vmul.f32 %v142_v59, %v1929_v17 }
  0x2e   :  { %1520 = vmatprep.mubr.bf16.mxu1 %v199_v36  ;;  %127 = vst.msk [vmem:[#allocation2 + $0xc0] sm:$0xff] %vm102_vm0, %v94_v43  ;;  %128 = vst.msk [vmem:[#allocation2 + $0xc8] sm:$0xff] %vm102_vm0, %v95_v44  ;;  %v201_v58 = vpack.c.bf16 %v2042_v54, %v2039_v53  ;;  %v2064_v1 = vmul.f32 %v143_v60, %v1929_v17  ;;  %v2067_v2 = vmul.f32 %v144_v61, %v1929_v17  ;;  %v145_v4 = vld [vmem:[#allocation2 + $0x50] sm:$0xff]  ;;  %v146_v5 = vld [vmem:[#allocation2 + $0x58] sm:$0xff] }
  0x2f   :  { %129 = vst.msk [vmem:[#allocation2 + $0xd0] sm:$0xff] %vm102_vm0, %v96_v45  ;;  %130 = vst.msk [vmem:[#allocation2 + $0xd8] sm:$0xff] %vm102_vm0, %v97_v46  ;;  %1519 = vmatpush3.bf16.msra.mxu1 %v1610_v38  ;;  %v202_v6 = vpack.c.bf16 %v2061_v0, %v2058_v63  ;;  %v147_v7 = vld [vmem:[#allocation2 + $0x60] sm:$0xff]  ;;  %v148_v8 = vld [vmem:[#allocation2 + $0x68] sm:$0xff]  ;;  %v2080_v11 = vmul.f32 %v145_v4, %v1929_v17  ;;  %v2083_v12 = vmul.f32 %v146_v5, %v1929_v17 }
  0x30   :  { %131 = vst.msk [vmem:[#allocation2 + $0xe0] sm:$0xff] %vm102_vm0, %v98_v47  ;;  %132 = vst.msk [vmem:[#allocation2 + $0xe8] sm:$0xff] %vm102_vm0, %v99_v50  ;;  %1552 = vmatprep.subr.bf16.mxu1 %v1611_v55  ;;  %v203_v9 = vpack.c.bf16 %v2067_v2, %v2064_v1  ;;  %v2086_v13 = vmul.f32 %v147_v7, %v1929_v17  ;;  %v2089_v14 = vmul.f32 %v148_v8, %v1929_v17  ;;  %v149_v19 = vld [vmem:[#allocation2 + $0x70] sm:$0xff]  ;;  %v150_v20 = vld [vmem:[#allocation2 + $0x78] sm:$0xff] }
  0x31   :  { %133 = vst.msk [vmem:[#allocation2 + $0xf0] sm:$0xff] %vm102_vm0, %v100_v51  ;;  %134 = vst.msk [vmem:[#allocation2 + $0xf8] sm:$0xff] %vm102_vm0, %v101_v52  ;;  %v204_v16 = vpack.c.bf16 %v2083_v12, %v2080_v11  ;;  %v151_v21 = vld [vmem:[#allocation2 + $0x80] sm:$0xff]  ;;  %v152_v22 = vld [vmem:[#allocation2 + $0x88] sm:$0xff]  ;;  %v2102_v24 = vmul.f32 %v149_v19, %v1929_v17  ;;  %v2105_v25 = vmul.f32 %v150_v20, %v1929_v17 }
  0x32   :  { %1521 = vmatmul.mubr.bf16.vlgmr.msra.gmra.mrb[0].mxu1 %v200_v56  ;;  %v205_v18 = vpack.c.bf16 %v2089_v14, %v2086_v13  ;;  %v1616_v23 = vld [vmem:[%s2796_s3 + $0x28] sm:$0xff]   ;;  %v2108_v26 = vmul.f32 %v151_v21, %v1929_v17  ;;  %v2111_v27 = vmul.f32 %v152_v22, %v1929_v17  ;;  %v1617_v28 = vld [vmem:[%s2796_s3 + $0x30] sm:$0xff]   ;;  %v154_v32 = vld [vmem:[#allocation2 + $0x98] sm:$0xff] }
  0x33   :  { %1524 = vmatprep.mubr.bf16.mxu1 %v201_v58  ;;  %1553 = vmatpush3.bf16.msra.mxu1 %v1611_v55  ;;  %v206_v29 = vpack.c.bf16 %v2105_v25, %v2102_v24  ;;  %v153_v31 = vld [vmem:[#allocation2 + $0x90] sm:$0xff]  ;;  %v155_v33 = vld [vmem:[#allocation2 + $0xa0] sm:$0xff]  ;;  %v156_v36 = vld [vmem:[#allocation2 + $0xa8] sm:$0xff]  ;;  %v2124_v38 = vmul.f32 %v154_v32, %v1929_v17 }
  0x34   :  { %1554 = vmatprep.subr.bf16.mxu1 %v1612_v62  ;;  %v207_v30 = vpack.c.bf16 %v2111_v27, %v2108_v26  ;;  %v2121_v37 = vmul.f32 %v153_v31, %v1929_v17  ;;  %v2127_v39 = vmul.f32 %v155_v33, %v1929_v17  ;;  %v2130_v40 = vmul.f32 %v156_v36, %v1929_v17  ;;  %v157_v43 = vld [vmem:[#allocation2 + $0xb0] sm:$0xff]  ;;  %v158_v44 = vld [vmem:[#allocation2 + $0xb8] sm:$0xff]  ;;  %v1625_v21 = vld [vmem:[%s2797_s4 + $0x24] ss:$8 sps:$4 sm:$0xff]  }
  0x35   :  { %2813 = vst [vmem:[#allocation6_spill] sm:$0xff] %v2124_v38  ;;  %v159_v45 = vld [vmem:[#allocation2 + $0xc0] sm:$0xff]  ;;  %v160_v46 = vld [vmem:[#allocation2 + $0xc8] sm:$0xff]  ;;  %v2137_v47 = vmul.f32 %v157_v43, %v1929_v17  ;;  %v2140_v50 = vmul.f32 %v158_v44, %v1929_v17  ;;  %v1622_v19 = vld [vmem:[%s2797_s4 + $0x14] ss:$8 sps:$4 sm:$0xff]  }
  0x36   :  { %2814 = vst [vmem:[#allocation7_spill] sm:$0xff] %v2127_v39  ;;  %2815 = vst [vmem:[#allocation8_spill] sm:$0xff] %v2130_v40  ;;  %v208_v41 = vpack.c.bf16 %v2124_v38, %v2121_v37  ;;  %v209_v42 = vpack.c.bf16 %v2130_v40, %v2127_v39  ;;  %v2143_v51 = vmul.f32 %v159_v45, %v1929_v17  ;;  %v161_v57 = vld [vmem:[#allocation2 + $0xd0] sm:$0xff]  ;;  %v162_v58 = vld [vmem:[#allocation2 + $0xd8] sm:$0xff] }
  0x37   :  { %1555 = vmatpush3.bf16.msra.mxu1 %v1612_v62  ;;  %2816 = vst [vmem:[#allocation9_spill] sm:$0xff] %v2137_v47  ;;  %2817 = vst [vmem:[#allocation10_spill] sm:$0xff] %v2140_v50  ;;  %v2146_v52 = vmul.f32 %v160_v46, %v1929_v17  ;;  %v210_v55 = vpack.c.bf16 %v2140_v50, %v2137_v47  ;;  %v163_v59 = vld [vmem:[#allocation2 + $0xe0] sm:$0xff]  ;;  %v164_v60 = vld [vmem:[#allocation2 + $0xe8] sm:$0xff]  ;;  %v2153_v61 = vmul.f32 %v161_v57, %v1929_v17 }
  0x38   :  { %1556 = vmatprep.subr.bf16.mxu1 %v1613_v3  ;;  %2818 = vst [vmem:[#allocation11_spill] sm:$0xff] %v2143_v51  ;;  %v2156_v62 = vmul.f32 %v162_v58, %v1929_v17  ;;  %v2162_v4 = vmul.f32 %v164_v60, %v1929_v17  ;;  %v165_v7 = vld [vmem:[#allocation2 + $0xf0] sm:$0xff]  ;;  %v166_v8 = vld [vmem:[#allocation2 + $0xf8] sm:$0xff]  ;;  %v1627_v22 = vld [vmem:[%s2797_s4 + $0x20] ss:$8 sps:$4 sm:$0xff]  }
  0x39   :  { %2819 = vst [vmem:[#allocation12_spill] sm:$0xff] %v2146_v52  ;;  %v211_v56 = vpack.c.bf16 %v2146_v52, %v2143_v51  ;;  %2820 = vst [vmem:[#allocation13_spill] sm:$0xff] %v2153_v61  ;;  %v1624_v20 = vld [vmem:[%s2797_s4 + $0x10] ss:$8 sps:$4 sm:$0xff]   ;;  %v1634_v31 = vld [vmem:[%s2797_s4 + $0x54] ss:$8 sps:$4 sm:$0xff]  }
  0x3a   :  { %1525 = vmatmul.mubr.bf16.gmra.mrb[4].mxu1 %v202_v6  ;;  %2821 = vst [vmem:[#allocation14_spill] sm:$0xff] %v2156_v62  ;;  %2823 = vst [vmem:[#allocation16_spill] sm:$0xff] %v2162_v4  ;;  %v212_v5 = vpack.c.bf16 %v2156_v62, %v2153_v61  ;;  %v1636_v32 = vld [vmem:[%s2797_s4 + $0x50] ss:$8 sps:$4 sm:$0xff]   ;;  %v2215_v33 = vld [vmem:[#allocation3 + $0x1] ss:$0 sm:$0xff] }
  0x3b   :  { %1528 = vmatprep.mubr.bf16.mxu1 %v203_v9  ;;  %1557 = vmatpush3.bf16.msra.mxu1 %v1613_v3  ;;  %v2159_v3 = vmul.f32 %v163_v59, %v1929_v17  ;;  %v2169_v9 = vmul.f32 %v165_v7, %v1929_v17 }
  0x3c   :  { %1558 = vmatprep.subr.bf16.mxu1 %v1614_v10 }
  0x3d   :  { %2822 = vst [vmem:[#allocation15_spill] sm:$0xff] %v2159_v3  ;;  %v213_v6 = vpack.c.bf16 %v2162_v4, %v2159_v3  ;;  %2824 = vst [vmem:[#allocation17_spill] sm:$0xff] %v2169_v9 }
  0x3f   :  { %1559 = vmatpush3.bf16.msra.mxu1 %v1614_v10  ;;  %v2172_v10 = vmul.f32 %v166_v8, %v1929_v17  ;;  %v1621_v17 = vld [vmem:[%s2797_s4] ss:$8 sps:$4 sm:$0xff]  }
  0x40   :  { %1560 = vmatprep.subr.bf16.mxu1 %v1615_v15 }
  0x41   :  { %2825 = vst [vmem:[#allocation18_spill] sm:$0xff] %v2172_v10 }
  0x42   :  { %1529 = vmatmul.mubr.bf16.gmra.mrb[8].mxu1 %v204_v16  ;;  %v1618_v16 = vld [vmem:[%s2796_s3 + $0x38] sm:$0xff]  }
  0x43   :  { %1532 = vmatprep.mubr.bf16.mxu1 %v205_v18  ;;  %1561 = vmatpush3.bf16.msra.mxu1 %v1615_v15  ;;  %v214_v15 = vpack.c.bf16 %v2172_v10, %v2169_v9  ;;  %v1619_v18 = vld [vmem:[%s2797_s4 + $0x4] ss:$8 sps:$4 sm:$0xff]  }
  0x44   :  { %1562 = vmatprep.subr.bf16.mxu1 %v1616_v23  ;;  %868 = vmatprep.subr.bf16.mxu0 %v1619_v18 }
  0x45   :  { %869 = vmatpush1.bf16.msra.mxu0 %v1621_v17 }
  0x46   :  { %870 = vmatprep.subr.bf16.mxu0 %v1622_v19 }
  0x47   :  { %1563 = vmatpush3.bf16.msra.mxu1 %v1616_v23  ;;  %v1628_v23 = vld [vmem:[%s2797_s4 + $0x34] ss:$8 sps:$4 sm:$0xff]  }
  0x48   :  { %1564 = vmatprep.subr.bf16.mxu1 %v1617_v28 }
  0x49   :  { %871 = vmatpush1.bf16.msra.mxu0 %v1624_v20 }
  0x4a   :  { %1533 = vmatmul.mubr.bf16.gmra.mrb[12].mxu1 %v206_v29  ;;  %872 = vmatprep.subr.bf16.mxu0 %v1625_v21  ;;  %v1631_v29 = vld [vmem:[%s2797_s4 + $0x44] ss:$8 sps:$4 sm:$0xff]  }
  0x4b   :  { %1536 = vmatprep.mubr.bf16.mxu1 %v207_v30  ;;  %1565 = vmatpush3.bf16.msra.mxu1 %v1617_v28  ;;  %v1630_v28 = vld [vmem:[%s2797_s4 + $0x30] ss:$8 sps:$4 sm:$0xff]   ;;  %v1633_v30 = vld [vmem:[%s2797_s4 + $0x40] ss:$8 sps:$4 sm:$0xff]  }
  0x4c   :  { %1566 = vmatprep.subr.bf16.mxu1 %v1618_v16 }
  0x4d   :  { %873 = vmatpush1.bf16.msra.mxu0 %v1627_v22 }
  0x4e   :  { %874 = vmatprep.subr.bf16.mxu0 %v1628_v23 }
  0x4f   :  { %1567 = vmatpush3.bf16.msra.mxu1 %v1618_v16 }
  0x51   :  { %875 = vmatpush1.bf16.msra.mxu0 %v1630_v28 }
  0x52   :  { %1537 = vmatmul.mubr.bf16.gmra.mrb[16].mxu1 %v208_v41  ;;  %876 = vmatprep.subr.bf16.mxu0 %v1631_v29 }
  0x53   :  { %1540 = vmatprep.mubr.bf16.mxu1 %v209_v42 }
  0x55   :  { %877 = vmatpush1.bf16.msra.mxu0 %v1633_v30 }
  0x56   :  { %878 = vmatprep.subr.bf16.mxu0 %v1634_v31 }
  0x59   :  { %879 = vmatpush1.bf16.msra.mxu0 %v1636_v32 }
  0x5a   :  { %1541 = vmatmul.mubr.bf16.gmra.mrb[20].mxu1 %v210_v55 }
  0x5b   :  { %1544 = vmatprep.mubr.bf16.mxu1 %v211_v56 }
  0x62   :  { %1545 = vmatmul.mubr.bf16.gmra.mrb[24].mxu1 %v212_v5 }
  0x63   :  { %1548 = vmatprep.mubr.bf16.mxu1 %v213_v6 }
  0x6a   :  { %1549 = vmatmul.mubr.bf16.gmra.mrb[28].mxu1 %v214_v15 }
 0x105   :  { %v1522_v36 = vpop.f32.mrb[0].mxu1 }
 0x106   :  { %v322_v41 = vadd.f32 %v1522_v36, %v2215_v33  ;;  %v313_v42 = vpop.f32.mrb[1].mxu1 }
 0x107   :  { %v314_v43 = vadd.f32 %v313_v42, %v2215_v33  ;;  %v1523_v44 = vpop.f32.mrb[2].mxu1 }
 0x108   :  { %v325_v45 = vadd.f32 %v1523_v44, %v2215_v33  ;;  %v316_v46 = vpop.f32.mrb[3].mxu1  ;;  %v442_v56 = vmax.f32 %v322_v41, 0.0 }
 0x109   :  { %v317_v55 = vadd.f32 %v316_v46, %v2215_v33  ;;  %v440_v58 = vmax.f32 %v314_v43, 0.0 }
 0x10a   :  { %v443_v57 = vmax.f32 %v325_v45, 0.0 }
 0x10b   :  { %v441_v59 = vmax.f32 %v317_v55, 0.0 }
 0x10c   :  { %v473_v60 = vpack.c.bf16 %v443_v57, %v442_v56 }
 0x10d   :  { %v472_v5 = vpack.c.bf16 %v441_v59, %v440_v58  ;;  %v1526_v6 = vpop.f32.mrb[4].mxu1 }
 0x10e   :  { %v338_v7 = vadd.f32 %v1526_v6, %v2215_v33  ;;  %v329_v8 = vpop.f32.mrb[5].mxu1 }
 0x10f   :  { %v330_v15 = vadd.f32 %v329_v8, %v2215_v33  ;;  %1568 = vmatprep.mubr.bf16.mxu1 %v472_v5  ;;  %v1527_v16 = vpop.f32.mrb[6].mxu1 }
 0x110   :  { %v446_v18 = vmax.f32 %v338_v7, 0.0  ;;  %v341_v17 = vadd.f32 %v1527_v16, %v2215_v33  ;;  %1569 = vmatmul.mubr.bf16.vlgmr.msra.gmra.mrb[32].mxu1 %v473_v60  ;;  %v332_v19 = vpop.f32.mrb[7].mxu1 }
 0x111   :  { %v444_v20 = vmax.f32 %v330_v15, 0.0  ;;  %v333_v21 = vadd.f32 %v332_v19, %v2215_v33 }
 0x112   :  { %v447_v22 = vmax.f32 %v341_v17, 0.0 }
 0x113   :  { %v445_v23 = vmax.f32 %v333_v21, 0.0 }
 0x114   :  { %v475_v28 = vpack.c.bf16 %v447_v22, %v446_v18 }
 0x115   :  { %v474_v29 = vpack.c.bf16 %v445_v23, %v444_v20  ;;  %v1530_v30 = vpop.f32.mrb[8].mxu1 }
 0x116   :  { %v354_v31 = vadd.f32 %v1530_v30, %v2215_v33  ;;  %v345_v32 = vpop.f32.mrb[9].mxu1 }
 0x117   :  { %1572 = vmatprep.mubr.bf16.mxu1 %v474_v29  ;;  %v346_v36 = vadd.f32 %v345_v32, %v2215_v33  ;;  %v1531_v41 = vpop.f32.mrb[10].mxu1 }
 0x118   :  { %1573 = vmatmul.mubr.bf16.gmra.mrb[36].mxu1 %v475_v28  ;;  %v450_v42 = vmax.f32 %v354_v31, 0.0  ;;  %v357_v43 = vadd.f32 %v1531_v41, %v2215_v33  ;;  %v348_v44 = vpop.f32.mrb[11].mxu1 }
 0x119   :  { %v448_v45 = vmax.f32 %v346_v36, 0.0  ;;  %v349_v46 = vadd.f32 %v348_v44, %v2215_v33 }
 0x11a   :  { %v451_v55 = vmax.f32 %v357_v43, 0.0 }
 0x11b   :  { %v449_v56 = vmax.f32 %v349_v46, 0.0 }
 0x11c   :  { %v477_v57 = vpack.c.bf16 %v451_v55, %v450_v42 }
 0x11d   :  { %v476_v58 = vpack.c.bf16 %v449_v56, %v448_v45  ;;  %v1534_v59 = vpop.f32.mrb[12].mxu1 }
 0x11e   :  { %v370_v60 = vadd.f32 %v1534_v59, %v2215_v33  ;;  %v361_v5 = vpop.f32.mrb[13].mxu1 }
 0x11f   :  { %1576 = vmatprep.mubr.bf16.mxu1 %v476_v58  ;;  %v362_v6 = vadd.f32 %v361_v5, %v2215_v33  ;;  %v1535_v7 = vpop.f32.mrb[14].mxu1 }
 0x120   :  { %1577 = vmatmul.mubr.bf16.gmra.mrb[40].mxu1 %v477_v57  ;;  %v454_v8 = vmax.f32 %v370_v60, 0.0  ;;  %v373_v15 = vadd.f32 %v1535_v7, %v2215_v33  ;;  %v364_v16 = vpop.f32.mrb[15].mxu1 }
 0x121   :  { %v452_v18 = vmax.f32 %v362_v6, 0.0  ;;  %v365_v17 = vadd.f32 %v364_v16, %v2215_v33 }
 0x122   :  { %v455_v19 = vmax.f32 %v373_v15, 0.0 }
 0x123   :  { %v453_v20 = vmax.f32 %v365_v17, 0.0 }
 0x124   :  { %v479_v21 = vpack.c.bf16 %v455_v19, %v454_v8 }
 0x125   :  { %v478_v22 = vpack.c.bf16 %v453_v20, %v452_v18  ;;  %v1538_v23 = vpop.f32.mrb[16].mxu1 }
 0x126   :  { %v386_v28 = vadd.f32 %v1538_v23, %v2215_v33  ;;  %v377_v29 = vpop.f32.mrb[17].mxu1 }
 0x127   :  { %1580 = vmatprep.mubr.bf16.mxu1 %v478_v22  ;;  %v378_v30 = vadd.f32 %v377_v29, %v2215_v33  ;;  %v1539_v31 = vpop.f32.mrb[18].mxu1 }
 0x128   :  { %1581 = vmatmul.mubr.bf16.gmra.mrb[44].mxu1 %v479_v21  ;;  %v458_v32 = vmax.f32 %v386_v28, 0.0  ;;  %v389_v36 = vadd.f32 %v1539_v31, %v2215_v33  ;;  %v380_v41 = vpop.f32.mrb[19].mxu1 }
 0x129   :  { %v456_v42 = vmax.f32 %v378_v30, 0.0  ;;  %v381_v43 = vadd.f32 %v380_v41, %v2215_v33 }
 0x12a   :  { %v459_v44 = vmax.f32 %v389_v36, 0.0 }
 0x12b   :  { %v457_v45 = vmax.f32 %v381_v43, 0.0 }
 0x12c   :  { %v481_v46 = vpack.c.bf16 %v459_v44, %v458_v32 }
 0x12d   :  { %v480_v55 = vpack.c.bf16 %v457_v45, %v456_v42  ;;  %v1542_v56 = vpop.f32.mrb[20].mxu1 }
 0x12e   :  { %v402_v57 = vadd.f32 %v1542_v56, %v2215_v33  ;;  %v393_v58 = vpop.f32.mrb[21].mxu1 }
 0x12f   :  { %1584 = vmatprep.mubr.bf16.mxu1 %v480_v55  ;;  %v394_v59 = vadd.f32 %v393_v58, %v2215_v33  ;;  %v1543_v60 = vpop.f32.mrb[22].mxu1 }
 0x130   :  { %1585 = vmatmul.mubr.bf16.gmra.mrb[48].mxu1 %v481_v46  ;;  %v462_v5 = vmax.f32 %v402_v57, 0.0  ;;  %v405_v6 = vadd.f32 %v1543_v60, %v2215_v33  ;;  %v396_v7 = vpop.f32.mrb[23].mxu1 }
 0x131   :  { %v460_v8 = vmax.f32 %v394_v59, 0.0  ;;  %v397_v15 = vadd.f32 %v396_v7, %v2215_v33 }
 0x132   :  { %v463_v16 = vmax.f32 %v405_v6, 0.0 }
 0x133   :  { %v461_v18 = vmax.f32 %v397_v15, 0.0 }
 0x134   :  { %v483_v17 = vpack.c.bf16 %v463_v16, %v462_v5 }
 0x135   :  { %v482_v19 = vpack.c.bf16 %v461_v18, %v460_v8  ;;  %v1546_v20 = vpop.f32.mrb[24].mxu1  ;;  %v1637_v18 = vld [vmem:[%s2797_s4 + $0x64] ss:$8 sps:$4 sm:$0xff]  }
 0x136   :  { %v418_v21 = vadd.f32 %v1546_v20, %v2215_v33  ;;  %v409_v22 = vpop.f32.mrb[25].mxu1  ;;  %880 = vmatprep.subr.bf16.mxu0 %v1637_v18  ;;  %v1830_v20 = vmov 0  }
 0x137   :  { %1588 = vmatprep.mubr.bf16.mxu1 %v482_v19  ;;  %v410_v23 = vadd.f32 %v409_v22, %v2215_v33  ;;  %v1547_v28 = vpop.f32.mrb[26].mxu1  ;;  %v1642_v19 = vld [vmem:[%s2797_s4 + $0x70] ss:$8 sps:$4 sm:$0xff]   ;;  %900 = vmatprep.mubr.bf16.mxu0 %v1830_v20 }
 0x138   :  { %1589 = vmatmul.mubr.bf16.gmra.mrb[52].mxu1 %v483_v17  ;;  %v466_v29 = vmax.f32 %v418_v21, 0.0  ;;  %v421_v30 = vadd.f32 %v1547_v28, %v2215_v33  ;;  %v412_v31 = vpop.f32.mrb[27].mxu1  ;;  %v1639_v17 = vld [vmem:[%s2797_s4 + $0x60] ss:$8 sps:$4 sm:$0xff]  }
 0x139   :  { %v464_v32 = vmax.f32 %v410_v23, 0.0  ;;  %v413_v36 = vadd.f32 %v412_v31, %v2215_v33  ;;  %881 = vmatpush1.bf16.msra.mxu0 %v1639_v17  ;;  %v2262_v21 = vld [vmem:[#allocation3 + $0x2] ss:$0 sm:$0xff] }
 0x13a   :  { %v467_v41 = vmax.f32 %v421_v30, 0.0 }
 0x13b   :  { %v465_v42 = vmax.f32 %v413_v36, 0.0 }
 0x13c   :  { %v485_v43 = vpack.c.bf16 %v467_v41, %v466_v29 }
 0x13d   :  { %v484_v44 = vpack.c.bf16 %v465_v42, %v464_v32  ;;  %v1550_v45 = vpop.f32.mrb[28].mxu1 }
 0x13e   :  { %v434_v46 = vadd.f32 %v1550_v45, %v2215_v33  ;;  %v425_v55 = vpop.f32.mrb[29].mxu1 }
 0x13f   :  { %1592 = vmatprep.mubr.bf16.mxu1 %v484_v44  ;;  %v426_v56 = vadd.f32 %v425_v55, %v2215_v33  ;;  %v1551_v57 = vpop.f32.mrb[30].mxu1 }
 0x140   :  { %1593 = vmatmul.mubr.bf16.gmra.mrb[56].mxu1 %v485_v43  ;;  %v470_v58 = vmax.f32 %v434_v46, 0.0  ;;  %v437_v59 = vadd.f32 %v1551_v57, %v2215_v33  ;;  %v428_v60 = vpop.f32.mrb[31].mxu1 }
 0x141   :  { %v468_v5 = vmax.f32 %v426_v56, 0.0  ;;  %v429_v6 = vadd.f32 %v428_v60, %v2215_v33  ;;  %v1640_v33 = vld [vmem:[%s2797_s4 + $0x74] ss:$8 sps:$4 sm:$0xff]  }
 0x142   :  { %v471_v7 = vmax.f32 %v437_v59, 0.0  ;;  %882 = vmatprep.subr.bf16.mxu0 %v1640_v33 }
 0x143   :  { %v469_v8 = vmax.f32 %v429_v6, 0.0  ;;  %883 = vmatpush1.bf16.msra.mxu0 %v1642_v19 }
 0x144   :  { %v487_v15 = vpack.c.bf16 %v471_v7, %v470_v58 }
 0x145   :  { %v486_v16 = vpack.c.bf16 %v469_v8, %v468_v5 }
 0x147   :  { %1596 = vmatprep.mubr.bf16.mxu1 %v486_v16 }
 0x148   :  { %1597 = vmatmul.mubr.bf16.gmra.mrb[60].mxu1 %v487_v15 }
 0x1e3   :  { %v1570_v22 = vpop.f32.mrb[32].mxu1 }
 0x1e4   :  { %v595_v23 = vadd.f32 %v1570_v22, %v2262_v21  ;;  %v586_v28 = vpop.f32.mrb[33].mxu1 }
 0x1e5   :  { %v587_v29 = vadd.f32 %v586_v28, %v2262_v21  ;;  %v1571_v30 = vpop.f32.mrb[34].mxu1 }
 0x1e6   :  { %v598_v31 = vadd.f32 %v1571_v30, %v2262_v21  ;;  %v589_v32 = vpop.f32.mrb[35].mxu1  ;;  %v715_v41 = vmax.f32 %v595_v23, 0.0 }
 0x1e7   :  { %v590_v36 = vadd.f32 %v589_v32, %v2262_v21  ;;  %v713_v43 = vmax.f32 %v587_v29, 0.0 }
 0x1e8   :  { %v716_v42 = vmax.f32 %v598_v31, 0.0 }
 0x1e9   :  { %v714_v44 = vmax.f32 %v590_v36, 0.0 }
 0x1ea   :  { %v746_v45 = vpack.c.bf16 %v716_v42, %v715_v41 }
 0x1eb   :  { %v745_v46 = vpack.c.bf16 %v714_v44, %v713_v43  ;;  %v1574_v55 = vpop.f32.mrb[36].mxu1 }
 0x1ec   :  { %v611_v56 = vadd.f32 %v1574_v55, %v2262_v21  ;;  %v602_v57 = vpop.f32.mrb[37].mxu1 }
 0x1ed   :  { %v603_v58 = vadd.f32 %v602_v57, %v2262_v21  ;;  %901 = vmatmul.mubr.bf16.vlgmr.msra.gmra.mrb[0].mxu0 %v745_v46  ;;  %v1575_v59 = vpop.f32.mrb[38].mxu1 }
 0x1ee   :  { %v719_v60 = vmax.f32 %v611_v56, 0.0  ;;  %v614_v5 = vadd.f32 %v1575_v59, %v2262_v21  ;;  %v605_v6 = vpop.f32.mrb[39].mxu1  ;;  %910 = vmatprep.mubr.bf16.mxu0 %v1830_v20 }
 0x1ef   :  { %v717_v7 = vmax.f32 %v603_v58, 0.0  ;;  %v606_v8 = vadd.f32 %v605_v6, %v2262_v21 }
 0x1f0   :  { %v720_v15 = vmax.f32 %v614_v5, 0.0 }
 0x1f1   :  { %v718_v16 = vmax.f32 %v606_v8, 0.0 }
 0x1f2   :  { %v748_v18 = vpack.c.bf16 %v720_v15, %v719_v60 }
 0x1f3   :  { %v747_v17 = vpack.c.bf16 %v718_v16, %v717_v7  ;;  %v1578_v33 = vpop.f32.mrb[40].mxu1 }
 0x1f4   :  { %v627_v19 = vadd.f32 %v1578_v33, %v2262_v21  ;;  %v618_v22 = vpop.f32.mrb[41].mxu1 }
 0x1f5   :  { %911 = vmatmul.mubr.bf16.gmra.mrb[4].mxu0 %v746_v45  ;;  %v619_v23 = vadd.f32 %v618_v22, %v2262_v21  ;;  %v1579_v28 = vpop.f32.mrb[42].mxu1 }
 0x1f6   :  { %v723_v29 = vmax.f32 %v627_v19, 0.0  ;;  %920 = vmatprep.mubr.bf16.mxu0 %v1830_v20  ;;  %v630_v30 = vadd.f32 %v1579_v28, %v2262_v21  ;;  %v621_v31 = vpop.f32.mrb[43].mxu1 }
 0x1f7   :  { %v721_v32 = vmax.f32 %v619_v23, 0.0  ;;  %v622_v36 = vadd.f32 %v621_v31, %v2262_v21 }
 0x1f8   :  { %v724_v41 = vmax.f32 %v630_v30, 0.0 }
 0x1f9   :  { %v722_v42 = vmax.f32 %v622_v36, 0.0 }
 0x1fa   :  { %v750_v43 = vpack.c.bf16 %v724_v41, %v723_v29 }
 0x1fb   :  { %v749_v44 = vpack.c.bf16 %v722_v42, %v721_v32  ;;  %v1582_v46 = vpop.f32.mrb[44].mxu1 }
 0x1fc   :  { %v643_v55 = vadd.f32 %v1582_v46, %v2262_v21  ;;  %v634_v45 = vpop.f32.mrb[45].mxu1 }
 0x1fd   :  { %921 = vmatmul.mubr.bf16.gmra.mrb[8].mxu0 %v747_v17  ;;  %v635_v56 = vadd.f32 %v634_v45, %v2262_v21  ;;  %v1583_v57 = vpop.f32.mrb[46].mxu1 }
 0x1fe   :  { %930 = vmatprep.mubr.bf16.mxu0 %v1830_v20  ;;  %v727_v58 = vmax.f32 %v643_v55, 0.0  ;;  %v646_v59 = vadd.f32 %v1583_v57, %v2262_v21  ;;  %v637_v60 = vpop.f32.mrb[47].mxu1 }
 0x1ff   :  { %v725_v5 = vmax.f32 %v635_v56, 0.0  ;;  %v638_v6 = vadd.f32 %v637_v60, %v2262_v21 }
 0x200   :  { %v728_v7 = vmax.f32 %v646_v59, 0.0 }
 0x201   :  { %v726_v8 = vmax.f32 %v638_v6, 0.0 }
 0x202   :  { %v2283_v15 = vpack.c.bf16 %v728_v7, %v727_v58 }
 0x203   :  { %v751_v16 = vpack.c.bf16 %v726_v8, %v725_v5  ;;  %v1586_v33 = vpop.f32.mrb[48].mxu1 }
 0x204   :  { %v659_v17 = vadd.f32 %v1586_v33, %v2262_v21  ;;  %v650_v19 = vpop.f32.mrb[49].mxu1 }
 0x205   :  { %931 = vmatmul.mubr.bf16.gmra.mrb[12].mxu0 %v748_v18  ;;  %v651_v22 = vadd.f32 %v650_v19, %v2262_v21  ;;  %v1587_v23 = vpop.f32.mrb[50].mxu1 }
 0x206   :  { %940 = vmatprep.mubr.bf16.mxu0 %v1830_v20  ;;  %v731_v28 = vmax.f32 %v659_v17, 0.0  ;;  %v662_v29 = vadd.f32 %v1587_v23, %v2262_v21  ;;  %v653_v30 = vpop.f32.mrb[51].mxu1 }
 0x207   :  { %v729_v31 = vmax.f32 %v651_v22, 0.0  ;;  %v654_v32 = vadd.f32 %v653_v30, %v2262_v21 }
 0x208   :  { %v732_v36 = vmax.f32 %v662_v29, 0.0 }
 0x209   :  { %v730_v41 = vmax.f32 %v654_v32, 0.0 }
 0x20a   :  { %v754_v42 = vpack.c.bf16 %v732_v36, %v731_v28 }
 0x20b   :  { %v753_v46 = vpack.c.bf16 %v730_v41, %v729_v31  ;;  %v1590_v55 = vpop.f32.mrb[52].mxu1 }
 0x20c   :  { %v675_v45 = vadd.f32 %v1590_v55, %v2262_v21  ;;  %v666_v18 = vpop.f32.mrb[53].mxu1 }
 0x20d   :  { %941 = vmatmul.mubr.bf16.gmra.mrb[16].mxu0 %v749_v44  ;;  %v667_v56 = vadd.f32 %v666_v18, %v2262_v21  ;;  %v1591_v57 = vpop.f32.mrb[54].mxu1 }
 0x20e   :  { %950 = vmatprep.mubr.bf16.mxu0 %v1830_v20  ;;  %v735_v58 = vmax.f32 %v675_v45, 0.0  ;;  %v678_v59 = vadd.f32 %v1591_v57, %v2262_v21  ;;  %v669_v60 = vpop.f32.mrb[55].mxu1 }
 0x20f   :  { %v733_v5 = vmax.f32 %v667_v56, 0.0  ;;  %v670_v6 = vadd.f32 %v669_v60, %v2262_v21 }
 0x210   :  { %v736_v7 = vmax.f32 %v678_v59, 0.0 }
 0x211   :  { %v734_v8 = vmax.f32 %v670_v6, 0.0 }
 0x212   :  { %v756_v33 = vpack.c.bf16 %v736_v7, %v735_v58 }
 0x213   :  { %v755_v17 = vpack.c.bf16 %v734_v8, %v733_v5  ;;  %v1594_v19 = vpop.f32.mrb[56].mxu1 }
 0x214   :  { %v691_v22 = vadd.f32 %v1594_v19, %v2262_v21  ;;  %v682_v44 = vpop.f32.mrb[57].mxu1 }
 0x215   :  { %951 = vmatmul.mubr.bf16.gmra.mrb[20].mxu0 %v750_v43  ;;  %v683_v23 = vadd.f32 %v682_v44, %v2262_v21  ;;  %v1595_v28 = vpop.f32.mrb[58].mxu1 }
 0x216   :  { %960 = vmatprep.mubr.bf16.mxu0 %v1830_v20  ;;  %v739_v29 = vmax.f32 %v691_v22, 0.0  ;;  %v694_v30 = vadd.f32 %v1595_v28, %v2262_v21  ;;  %v685_v31 = vpop.f32.mrb[59].mxu1 }
 0x217   :  { %v737_v32 = vmax.f32 %v683_v23, 0.0  ;;  %v686_v36 = vadd.f32 %v685_v31, %v2262_v21 }
 0x218   :  { %v740_v41 = vmax.f32 %v694_v30, 0.0 }
 0x219   :  { %v738_v55 = vmax.f32 %v686_v36, 0.0 }
 0x21a   :  { %v758_v45 = vpack.c.bf16 %v740_v41, %v739_v29 }
 0x21b   :  { %v757_v18 = vpack.c.bf16 %v738_v55, %v737_v32  ;;  %v1598_v56 = vpop.f32.mrb[60].mxu1 }
 0x21c   :  { %v707_v57 = vadd.f32 %v1598_v56, %v2262_v21  ;;  %v698_v43 = vpop.f32.mrb[61].mxu1 }
 0x21d   :  { %961 = vmatmul.mubr.bf16.gmra.mrb[24].mxu0 %v751_v16  ;;  %v699_v58 = vadd.f32 %v698_v43, %v2262_v21  ;;  %v1599_v59 = vpop.f32.mrb[62].mxu1 }
 0x21e   :  { %970 = vmatprep.mubr.bf16.mxu0 %v1830_v20  ;;  %v743_v60 = vmax.f32 %v707_v57, 0.0  ;;  %v710_v5 = vadd.f32 %v1599_v59, %v2262_v21  ;;  %v701_v6 = vpop.f32.mrb[63].mxu1 }
 0x21f   :  { %v741_v7 = vmax.f32 %v699_v58, 0.0  ;;  %v702_v8 = vadd.f32 %v701_v6, %v2262_v21  ;;  %v2799_v21 = vlaneseq }
 0x220   :  { %v744_v19 = vmax.f32 %v710_v5, 0.0 }
 0x221   :  { %v742_v22 = vmax.f32 %v702_v8, 0.0 }
 0x222   :  { %v760_v44 = vpack.c.bf16 %v744_v19, %v743_v60 }
 0x223   :  { %v759_v23 = vpack.c.bf16 %v742_v22, %v741_v7 }
 0x225   :  { %971 = vmatmul.mubr.bf16.gmra.mrb[28].mxu0 %v2283_v15  ;;  %v779_v15 = vshrl.u32 %v2799_v21, 7 }
 0x226   :  { %980 = vmatprep.mubr.bf16.mxu0 %v1830_v20 }
 0x227   :  { %v780_v16 = vsub.s32 0, %v779_v15  ;;  %v784_v6 = vsub.s32 1, %v779_v15 }
 0x22d   :  { %981 = vmatmul.mubr.bf16.gmra.mrb[32].mxu0 %v753_v46 }
 0x22e   :  { %990 = vmatprep.mubr.bf16.mxu0 %v1830_v20 }
 0x235   :  { %991 = vmatmul.mubr.bf16.gmra.mrb[36].mxu0 %v754_v42  ;;  %v37_v42 = vld [vmem:[#allocation3 + $0x3] ss:$8 sm:$0x3] }
 0x236   :  { %1000 = vmatprep.mubr.bf16.mxu0 %v1830_v20  ;;  %v2315_v46 = vrot.slane %v37_v42, %v780_v16 }
 0x23d   :  { %1001 = vmatmul.mubr.bf16.gmra.mrb[40].mxu0 %v755_v17 }
 0x23e   :  { %1010 = vmatprep.mubr.bf16.mxu0 %v1830_v20 }
 0x245   :  { %1011 = vmatmul.mubr.bf16.gmra.mrb[44].mxu0 %v756_v33 }
 0x246   :  { %1020 = vmatprep.mubr.bf16.mxu0 %v1830_v20 }
 0x24d   :  { %1021 = vmatmul.mubr.bf16.gmra.mrb[48].mxu0 %v757_v18 }
 0x24e   :  { %1030 = vmatprep.mubr.bf16.mxu0 %v1830_v20 }
 0x255   :  { %1031 = vmatmul.mubr.bf16.gmra.mrb[52].mxu0 %v758_v45 }
 0x256   :  { %1040 = vmatprep.mubr.bf16.mxu0 %v1830_v20 }
 0x25d   :  { %1041 = vmatmul.mubr.bf16.gmra.mrb[56].mxu0 %v759_v23  ;;  %v2331_v23 = vrot.slane %v37_v42, %v784_v6 }
 0x25e   :  { %1050 = vmatprep.mubr.bf16.mxu0 %v1830_v20 }
 0x265   :  { %1051 = vmatmul.mubr.bf16.gmra.mrb[60].mxu0 %v760_v44 }
 0x2c0   :  { %v902_v33 = vpop.f32.mrb[0].mxu0 }
 0x2c1   :  { %v903_v17 = vadd.f32 %v902_v33, %v2315_v46  ;;  %v904_v28 = vpop.f32.mrb[1].mxu0 }
 0x2c2   :  { %v906_v29 = vpop.f32.mrb[2].mxu0 }
 0x2c3   :  { %1643 = vtanh.f32 %v903_v17  ;;  %v907_v30 = vadd.f32 %v906_v29, %v2315_v46  ;;  %v908_v31 = vpop.f32.mrb[3].mxu0 }
 0x2c5   :  { %1645 = vtanh.f32 %v907_v30 }
 0x2c8   :  { %v912_v32 = vpop.f32.mrb[4].mxu0 }
 0x2c9   :  { %v913_v20 = vadd.f32 %v912_v32, %v2315_v46  ;;  %v2320_v36 = vpop.f32.mrb[5].mxu0  ;;  %v905_v32 = vadd.f32 %v904_v28, %v2331_v23 }
 0x2ca   :  { %v916_v41 = vpop.f32.mrb[6].mxu0 }
 0x2cb   :  { %1647 = vtanh.f32 %v913_v20  ;;  %v917_v55 = vadd.f32 %v916_v41, %v2315_v46  ;;  %v2323_v45 = vpop.f32.mrb[7].mxu0  ;;  %v1771_v20 = vld [vmem:[#allocation2] sm:$0xff] }
 0x2cd   :  { %v1644_v18 = vpop.eup %1643  ;;  %1649 = vtanh.f32 %v917_v55 }
 0x2ce   :  { %v1094_v56 = vmul.f32 1.442695, %v1644_v18  ;;  %1286 = vadd.xlane.f32.xlu0 %v1644_v18 }
 0x2cf   :  { %v1646_v57 = vpop.eup %1645 }
 0x2d0   :  { %1651 = vpow2.f32 %v1094_v56  ;;  %v1096_v43 = vmul.f32 1.442695, %v1646_v57  ;;  %v922_v58 = vpop.f32.mrb[8].mxu0 }
 0x2d1   :  { %v923_v59 = vadd.f32 %v922_v58, %v2315_v46  ;;  %v2326_v60 = vpop.f32.mrb[9].mxu0  ;;  %v1772_v58 = vld [vmem:[#allocation2 + $0x8] sm:$0xff] }
 0x2d2   :  { %1653 = vpow2.f32 %v1096_v43  ;;  %v926_v5 = vpop.f32.mrb[10].mxu0  ;;  %1288 = vadd.xlane.f32.xlu0 %v1646_v57  ;;  %v909_v43 = vadd.f32 %v908_v31, %v2331_v23  ;;  %v915_v31 = vadd.f32 %v2320_v36, %v2331_v23 }
 0x2d3   :  { %1655 = vtanh.f32 %v923_v59  ;;  %v927_v7 = vadd.f32 %v926_v5, %v2315_v46  ;;  %v2329_v8 = vpop.f32.mrb[11].mxu0 }
 0x2d5   :  { %v1648_v19 = vpop.eup %1647  ;;  %1657 = vtanh.f32 %v927_v7 }
 0x2d6   :  { %v1098_v22 = vmul.f32 1.442695, %v1648_v19  ;;  %1290 = vadd.xlane.f32.xlu1 %v1648_v19 }
 0x2d7   :  { %v1650_v44 = vpop.eup %1649 }
 0x2d8   :  { %1659 = vpow2.f32 %v1098_v22  ;;  %v1100_v16 = vmul.f32 1.442695, %v1650_v44  ;;  %v932_v33 = vpop.f32.mrb[12].mxu0 }
 0x2d9   :  { %v933_v17 = vadd.f32 %v932_v33, %v2315_v46  ;;  %v2334_v29 = vpop.f32.mrb[13].mxu0 }
 0x2da   :  { %v1652_v15 = vpop.eup %1651  ;;  %1661 = vpow2.f32 %v1100_v16  ;;  %v936_v30 = vpop.f32.mrb[14].mxu0  ;;  %1292 = vadd.xlane.f32.xlu1 %v1650_v44 }
 0x2db   :  { %v1158_v41 = vmul.f32 %v1771_v20, %v1652_v15  ;;  %1663 = vtanh.f32 %v933_v17  ;;  %v937_v55 = vadd.f32 %v936_v30, %v2315_v46  ;;  %v2338_v42 = vpop.f32.mrb[15].mxu0  ;;  %v1773_v17 = vld [vmem:[#allocation2 + $0x10] sm:$0xff] }
 0x2dc   :  { %v1654_v18 = vpop.eup %1653 }
 0x2dd   :  { %v1656_v56 = vpop.eup %1655  ;;  %v2340_v57 = vadd.f32 %v1158_v41, %v905_v32  ;;  %v1159_v59 = vmul.f32 %v1772_v58, %v1654_v18  ;;  %1665 = vtanh.f32 %v937_v55  ;;  %v919_v18 = vadd.f32 %v2323_v45, %v2331_v23 }
 0x2de   :  { %v1102_v5 = vmul.f32 1.442695, %v1656_v56  ;;  %1294 = vadd.xlane.f32.xlu0 %v1656_v56  ;;  %v1774_v56 = vld [vmem:[#allocation2 + $0x18] sm:$0xff]  ;;  %v925_v45 = vadd.f32 %v2326_v60, %v2331_v23 }
 0x2df   :  { %v1658_v6 = vpop.eup %1657  ;;  %v2343_v28 = vadd.f32 %v1159_v59, %v909_v43 }
 0x2e0   :  { %1667 = vpow2.f32 %v1102_v5  ;;  %v1104_v7 = vmul.f32 1.442695, %v1658_v6  ;;  %v942_v19 = vpop.f32.mrb[16].mxu0  ;;  %1296 = vadd.xlane.f32.xlu1 %v1658_v6 }
 0x2e1   :  { %v943_v22 = vadd.f32 %v942_v19, %v2315_v46  ;;  %v2346_v44 = vpop.f32.mrb[17].mxu0 }
 0x2e2   :  { %v1660_v16 = vpop.eup %1659  ;;  %1669 = vpow2.f32 %v1104_v7  ;;  %v946_v33 = vpop.f32.mrb[18].mxu0 }
 0x2e3   :  { %v1160_v15 = vmul.f32 %v1773_v17, %v1660_v16  ;;  %1671 = vtanh.f32 %v943_v22  ;;  %v947_v30 = vadd.f32 %v946_v33, %v2315_v46  ;;  %v2351_v32 = vpop.f32.mrb[19].mxu0  ;;  %v1775_v33 = vld [vmem:[#allocation2 + $0x20] sm:$0xff] }
 0x2e4   :  { %v1662_v20 = vpop.eup %1661 }
 0x2e5   :  { %v1664_v41 = vpop.eup %1663  ;;  %v2353_v55 = vadd.f32 %v1160_v15, %v915_v31  ;;  %v1161_v43 = vmul.f32 %v1774_v56, %v1662_v20  ;;  %1673 = vtanh.f32 %v947_v30  ;;  %v1776_v56 = vld [vmem:[#allocation2 + $0x28] sm:$0xff] }
 0x2e6   :  { %v1106_v58 = vmul.f32 1.442695, %v1664_v41  ;;  %1298 = vadd.xlane.f32.xlu0 %v1664_v41 }
 0x2e7   :  { %v1666_v36 = vpop.eup %1665  ;;  %v2357_v59 = vadd.f32 %v1161_v43, %v919_v18  ;;  %v929_v18 = vadd.f32 %v2329_v8, %v2331_v23  ;;  %v935_v8 = vadd.f32 %v2334_v29, %v2331_v23 }
 0x2e8   :  { %1675 = vpow2.f32 %v1106_v58  ;;  %v1108_v5 = vmul.f32 1.442695, %v1666_v36  ;;  %v952_v6 = vpop.f32.mrb[20].mxu0  ;;  %1300 = vadd.xlane.f32.xlu1 %v1666_v36 }
 0x2e9   :  { %v953_v7 = vadd.f32 %v952_v6, %v2315_v46  ;;  %v2360_v19 = vpop.f32.mrb[21].mxu0 }
 0x2ea   :  { %v1668_v22 = vpop.eup %1667  ;;  %1677 = vpow2.f32 %v1108_v5  ;;  %v956_v16 = vpop.f32.mrb[22].mxu0 }
 0x2eb   :  { %v1162_v31 = vmul.f32 %v1775_v33, %v1668_v22  ;;  %1679 = vtanh.f32 %v953_v7  ;;  %v957_v17 = vadd.f32 %v956_v16, %v2315_v46  ;;  %v2365_v15 = vpop.f32.mrb[23].mxu0  ;;  %v1777_v33 = vld [vmem:[#allocation2 + $0x30] sm:$0xff] }
 0x2ec   :  { %v1670_v30 = vpop.eup %1669 }
 0x2ed   :  { %v1672_v20 = vpop.eup %1671  ;;  %v2367_v41 = vadd.f32 %v1162_v31, %v925_v45  ;;  %v1163_v43 = vmul.f32 %v1776_v56, %v1670_v30  ;;  %1681 = vtanh.f32 %v957_v17 }
 0x2ee   :  { %v1110_v58 = vmul.f32 1.442695, %v1672_v20  ;;  %1302 = vadd.xlane.f32.xlu0 %v1672_v20 }
 0x2ef   :  { %v1674_v60 = vpop.eup %1673  ;;  %v2371_v36 = vadd.f32 %v1163_v43, %v929_v18  ;;  %v939_v43 = vadd.f32 %v2338_v42, %v2331_v23  ;;  %v945_v42 = vadd.f32 %v2346_v44, %v2331_v23 }
 0x2f0   :  { %1683 = vpow2.f32 %v1110_v58  ;;  %v1112_v5 = vmul.f32 1.442695, %v1674_v60  ;;  %v962_v6 = vpop.f32.mrb[24].mxu0  ;;  %1304 = vadd.xlane.f32.xlu1 %v1674_v60  ;;  %v1778_v58 = vld [vmem:[#allocation2 + $0x38] sm:$0xff] }
 0x2f1   :  { %v963_v7 = vadd.f32 %v962_v6, %v2315_v46  ;;  %v2374_v22 = vpop.f32.mrb[25].mxu0 }
 0x2f2   :  { %v1676_v16 = vpop.eup %1675  ;;  %1685 = vpow2.f32 %v1112_v5  ;;  %v966_v45 = vpop.f32.mrb[26].mxu0 }
 0x2f3   :  { %v1164_v31 = vmul.f32 %v1777_v33, %v1676_v16  ;;  %1687 = vtanh.f32 %v963_v7  ;;  %v967_v17 = vadd.f32 %v966_v45, %v2315_v46  ;;  %v2379_v30 = vpop.f32.mrb[27].mxu0 }
 0x2f4   :  { %v1678_v20 = vpop.eup %1677 }
 0x2f5   :  { %v1680_v18 = vpop.eup %1679  ;;  %v2381_v56 = vadd.f32 %v1164_v31, %v935_v8  ;;  %v1165_v60 = vmul.f32 %v1778_v58, %v1678_v20  ;;  %1689 = vtanh.f32 %v967_v17  ;;  %v1779_v17 = vld [vmem:[#allocation2 + $0x40] sm:$0xff] }
 0x2f6   :  { %v1114_v5 = vmul.f32 1.442695, %v1680_v18  ;;  %1306 = vadd.xlane.f32.xlu0 %v1680_v18 }
 0x2f7   :  { %v1682_v29 = vpop.eup %1681  ;;  %v2385_v6 = vadd.f32 %v1165_v60, %v939_v43 }
 0x2f8   :  { %1691 = vpow2.f32 %v1114_v5  ;;  %v1116_v7 = vmul.f32 1.442695, %v1682_v29  ;;  %v972_v16 = vpop.f32.mrb[28].mxu0  ;;  %1308 = vadd.xlane.f32.xlu1 %v1682_v29  ;;  %v949_v29 = vadd.f32 %v2351_v32, %v2331_v23  ;;  %v955_v32 = vadd.f32 %v2360_v19, %v2331_v23 }
 0x2f9   :  { %v973_v45 = vadd.f32 %v972_v16, %v2315_v46  ;;  %v2388_v33 = vpop.f32.mrb[29].mxu0  ;;  %v1780_v16 = vld [vmem:[#allocation2 + $0x48] sm:$0xff] }
 0x2fa   :  { %v1684_v8 = vpop.eup %1683  ;;  %1693 = vpow2.f32 %v1116_v7  ;;  %v976_v31 = vpop.f32.mrb[30].mxu0 }
 0x2fb   :  { %v1166_v20 = vmul.f32 %v1779_v17, %v1684_v8  ;;  %1695 = vtanh.f32 %v973_v45  ;;  %v977_v18 = vadd.f32 %v976_v31, %v2315_v46  ;;  %v2393_v43 = vpop.f32.mrb[31].mxu0 }
 0x2fc   :  { %v1686_v58 = vpop.eup %1685 }
 0x2fd   :  { %v1688_v60 = vpop.eup %1687  ;;  %v2395_v5 = vadd.f32 %v1166_v20, %v945_v42  ;;  %v1167_v7 = vmul.f32 %v1780_v16, %v1686_v58  ;;  %1697 = vtanh.f32 %v977_v18  ;;  %v1781_v18 = vld [vmem:[#allocation2 + $0x50] sm:$0xff] }
 0x2fe   :  { %v1118_v21 = vmul.f32 1.442695, %v1688_v60  ;;  %1310 = vadd.xlane.f32.xlu0 %v1688_v60 }
 0x2ff   :  { %v1690_v44 = vpop.eup %1689  ;;  %v2399_v10 = vadd.f32 %v1167_v7, %v949_v29 }
 0x300   :  { %1699 = vpow2.f32 %v1118_v21  ;;  %v1120_v45 = vmul.f32 1.442695, %v1690_v44  ;;  %v982_v8 = vpop.f32.mrb[32].mxu0  ;;  %1312 = vadd.xlane.f32.xlu1 %v1690_v44  ;;  %v959_v44 = vadd.f32 %v2365_v15, %v2331_v23  ;;  %v965_v15 = vadd.f32 %v2374_v22, %v2331_v23 }
 0x301   :  { %v983_v31 = vadd.f32 %v982_v8, %v2315_v46  ;;  %v2402_v17 = vpop.f32.mrb[33].mxu0  ;;  %v1782_v8 = vld [vmem:[#allocation2 + $0x58] sm:$0xff] }
 0x302   :  { %v1692_v42 = vpop.eup %1691  ;;  %1701 = vpow2.f32 %v1120_v45  ;;  %v986_v20 = vpop.f32.mrb[34].mxu0 }
 0x303   :  { %v1168_v58 = vmul.f32 %v1781_v18, %v1692_v42  ;;  %1703 = vtanh.f32 %v983_v31  ;;  %v987_v60 = vadd.f32 %v986_v20, %v2315_v46  ;;  %v2407_v29 = vpop.f32.mrb[35].mxu0 }
 0x304   :  { %v1694_v21 = vpop.eup %1693 }
 0x305   :  { %v1696_v16 = vpop.eup %1695  ;;  %v2409_v7 = vadd.f32 %v1168_v58, %v955_v32  ;;  %v1169_v45 = vmul.f32 %v1782_v8, %v1694_v21  ;;  %1705 = vtanh.f32 %v987_v60  ;;  %v1783_v60 = vld [vmem:[#allocation2 + $0x60] sm:$0xff] }
 0x306   :  { %v1122_v9 = vmul.f32 1.442695, %v1696_v16  ;;  %1314 = vadd.xlane.f32.xlu0 %v1696_v16 }
 0x307   :  { %v1698_v19 = vpop.eup %1697  ;;  %v2413_v4 = vadd.f32 %v1169_v45, %v959_v44 }
 0x308   :  { %1707 = vpow2.f32 %v1122_v9  ;;  %v1124_v31 = vmul.f32 1.442695, %v1698_v19  ;;  %v992_v42 = vpop.f32.mrb[36].mxu0  ;;  %1316 = vadd.xlane.f32.xlu1 %v1698_v19  ;;  %v969_v19 = vadd.f32 %v2379_v30, %v2331_v23  ;;  %v975_v30 = vadd.f32 %v2388_v33, %v2331_v23 }
 0x309   :  { %v993_v20 = vadd.f32 %v992_v42, %v2315_v46  ;;  %v2416_v18 = vpop.f32.mrb[37].mxu0  ;;  %v1784_v42 = vld [vmem:[#allocation2 + $0x68] sm:$0xff] }
 0x30a   :  { %v1700_v32 = vpop.eup %1699  ;;  %1709 = vpow2.f32 %v1124_v31  ;;  %v996_v58 = vpop.f32.mrb[38].mxu0 }
 0x30b   :  { %v1170_v21 = vmul.f32 %v1783_v60, %v1700_v32  ;;  %1711 = vtanh.f32 %v993_v20  ;;  %v997_v16 = vadd.f32 %v996_v58, %v2315_v46  ;;  %v2421_v44 = vpop.f32.mrb[39].mxu0 }
 0x30c   :  { %v1702_v9 = vpop.eup %1701 }
 0x30d   :  { %v1704_v8 = vpop.eup %1703  ;;  %v2423_v45 = vadd.f32 %v1170_v21, %v965_v15  ;;  %v1171_v31 = vmul.f32 %v1784_v42, %v1702_v9  ;;  %1713 = vtanh.f32 %v997_v16  ;;  %v1785_v16 = vld [vmem:[#allocation2 + $0x70] sm:$0xff] }
 0x30e   :  { %v1126_v3 = vmul.f32 1.442695, %v1704_v8  ;;  %1318 = vadd.xlane.f32.xlu0 %v1704_v8 }
 0x30f   :  { %v1706_v22 = vpop.eup %1705  ;;  %v2427_v62 = vadd.f32 %v1171_v31, %v969_v19 }
 0x310   :  { %1715 = vpow2.f32 %v1126_v3  ;;  %v1128_v20 = vmul.f32 1.442695, %v1706_v22  ;;  %v1002_v32 = vpop.f32.mrb[40].mxu0  ;;  %1320 = vadd.xlane.f32.xlu1 %v1706_v22  ;;  %v979_v22 = vadd.f32 %v2393_v43, %v2331_v23  ;;  %v985_v43 = vadd.f32 %v2402_v17, %v2331_v23 }
 0x311   :  { %v1003_v58 = vadd.f32 %v1002_v32, %v2315_v46  ;;  %v2430_v60 = vpop.f32.mrb[41].mxu0  ;;  %v1786_v32 = vld [vmem:[#allocation2 + $0x78] sm:$0xff] }
 0x312   :  { %v1708_v15 = vpop.eup %1707  ;;  %1717 = vpow2.f32 %v1128_v20  ;;  %v1006_v21 = vpop.f32.mrb[42].mxu0 }
 0x313   :  { %v1172_v9 = vmul.f32 %v1785_v16, %v1708_v15  ;;  %1719 = vtanh.f32 %v1003_v58  ;;  %v1007_v8 = vadd.f32 %v1006_v21, %v2315_v46  ;;  %v2435_v19 = vpop.f32.mrb[43].mxu0 }
 0x314   :  { %v1710_v3 = vpop.eup %1709 }
 0x315   :  { %v1712_v42 = vpop.eup %1711  ;;  %v2437_v31 = vadd.f32 %v1172_v9, %v975_v30  ;;  %v1173_v20 = vmul.f32 %v1786_v32, %v1710_v3  ;;  %1721 = vtanh.f32 %v1007_v8  ;;  %v1787_v8 = vld [vmem:[#allocation2 + $0x80] sm:$0xff] }
 0x316   :  { %v1130_v61 = vmul.f32 1.442695, %v1712_v42  ;;  %1322 = vadd.xlane.f32.xlu0 %v1712_v42 }
 0x317   :  { %v1714_v33 = vpop.eup %1713  ;;  %v2441_v52 = vadd.f32 %v1173_v20, %v979_v22 }
 0x318   :  { %1723 = vpow2.f32 %v1130_v61  ;;  %v1132_v58 = vmul.f32 1.442695, %v1714_v33  ;;  %v1012_v15 = vpop.f32.mrb[44].mxu0  ;;  %1324 = vadd.xlane.f32.xlu1 %v1714_v33  ;;  %v989_v33 = vadd.f32 %v2407_v29, %v2331_v23  ;;  %v995_v29 = vadd.f32 %v2416_v18, %v2331_v23 }
 0x319   :  { %v1013_v21 = vadd.f32 %v1012_v15, %v2315_v46  ;;  %v2444_v16 = vpop.f32.mrb[45].mxu0  ;;  %v1788_v15 = vld [vmem:[#allocation2 + $0x88] sm:$0xff] }
 0x31a   :  { %v1716_v30 = vpop.eup %1715  ;;  %1725 = vpow2.f32 %v1132_v58  ;;  %v1016_v9 = vpop.f32.mrb[46].mxu0 }
 0x31b   :  { %v1174_v3 = vmul.f32 %v1787_v8, %v1716_v30  ;;  %1727 = vtanh.f32 %v1013_v21  ;;  %v1017_v42 = vadd.f32 %v1016_v9, %v2315_v46  ;;  %v2449_v22 = vpop.f32.mrb[47].mxu0 }
 0x31c   :  { %v1718_v61 = vpop.eup %1717 }
 0x31d   :  { %v1720_v32 = vpop.eup %1719  ;;  %v2451_v20 = vadd.f32 %v1174_v3, %v985_v43  ;;  %v1175_v58 = vmul.f32 %v1788_v15, %v1718_v61  ;;  %1729 = vtanh.f32 %v1017_v42  ;;  %v1789_v42 = vld [vmem:[#allocation2 + $0x90] sm:$0xff] }
 0x31e   :  { %v1134_v51 = vmul.f32 1.442695, %v1720_v32  ;;  %1326 = vadd.xlane.f32.xlu0 %v1720_v32 }
 0x31f   :  { %v1722_v17 = vpop.eup %1721  ;;  %v2455_v50 = vadd.f32 %v1175_v58, %v989_v33 }
 0x320   :  { %1731 = vpow2.f32 %v1134_v51  ;;  %v1136_v21 = vmul.f32 1.442695, %v1722_v17  ;;  %v1022_v30 = vpop.f32.mrb[48].mxu0  ;;  %1328 = vadd.xlane.f32.xlu1 %v1722_v17  ;;  %v999_v17 = vadd.f32 %v2421_v44, %v2331_v23  ;;  %v1005_v44 = vadd.f32 %v2430_v60, %v2331_v23 }
 0x321   :  { %v1023_v9 = vadd.f32 %v1022_v30, %v2315_v46  ;;  %v2458_v8 = vpop.f32.mrb[49].mxu0  ;;  %v1790_v30 = vld [vmem:[#allocation2 + $0x98] sm:$0xff] }
 0x322   :  { %v1724_v43 = vpop.eup %1723  ;;  %1733 = vpow2.f32 %v1136_v21  ;;  %v1026_v3 = vpop.f32.mrb[50].mxu0 }
 0x323   :  { %v1176_v61 = vmul.f32 %v1789_v42, %v1724_v43  ;;  %1735 = vtanh.f32 %v1023_v9  ;;  %v1027_v32 = vadd.f32 %v1026_v3, %v2315_v46  ;;  %v2463_v33 = vpop.f32.mrb[51].mxu0 }
 0x324   :  { %v1726_v51 = vpop.eup %1725 }
 0x325   :  { %v1728_v15 = vpop.eup %1727  ;;  %v2465_v58 = vadd.f32 %v1176_v61, %v995_v29  ;;  %v1177_v21 = vmul.f32 %v1790_v30, %v1726_v51  ;;  %1737 = vtanh.f32 %v1027_v32  ;;  %v1791_v32 = vld [vmem:[#allocation2 + $0xa0] sm:$0xff] }
 0x326   :  { %v1138_v47 = vmul.f32 1.442695, %v1728_v15  ;;  %1330 = vadd.xlane.f32.xlu0 %v1728_v15 }
 0x327   :  { %v1730_v18 = vpop.eup %1729  ;;  %v2469_v40 = vadd.f32 %v1177_v21, %v999_v17 }
 0x328   :  { %1739 = vpow2.f32 %v1138_v47  ;;  %v1140_v9 = vmul.f32 1.442695, %v1730_v18  ;;  %v1032_v43 = vpop.f32.mrb[52].mxu0  ;;  %1332 = vadd.xlane.f32.xlu1 %v1730_v18  ;;  %v1009_v18 = vadd.f32 %v2435_v19, %v2331_v23  ;;  %v1015_v19 = vadd.f32 %v2444_v16, %v2331_v23 }
 0x329   :  { %v1033_v3 = vadd.f32 %v1032_v43, %v2315_v46  ;;  %v2472_v42 = vpop.f32.mrb[53].mxu0  ;;  %v1792_v43 = vld [vmem:[#allocation2 + $0xa8] sm:$0xff] }
 0x32a   :  { %v1732_v29 = vpop.eup %1731  ;;  %1741 = vpow2.f32 %v1140_v9  ;;  %v1036_v61 = vpop.f32.mrb[54].mxu0 }
 0x32b   :  { %v1178_v51 = vmul.f32 %v1791_v32, %v1732_v29  ;;  %1743 = vtanh.f32 %v1033_v3  ;;  %v1037_v15 = vadd.f32 %v1036_v61, %v2315_v46  ;;  %v2477_v17 = vpop.f32.mrb[55].mxu0 }
 0x32c   :  { %v1734_v47 = vpop.eup %1733 }
 0x32d   :  { %v1736_v30 = vpop.eup %1735  ;;  %v2479_v21 = vadd.f32 %v1178_v51, %v1005_v44  ;;  %v1179_v9 = vmul.f32 %v1792_v43, %v1734_v47  ;;  %1745 = vtanh.f32 %v1037_v15  ;;  %v1793_v15 = vld [vmem:[#allocation2 + $0xb0] sm:$0xff] }
 0x32e   :  { %v1142_v39 = vmul.f32 1.442695, %v1736_v30  ;;  %1334 = vadd.xlane.f32.xlu0 %v1736_v30 }
 0x32f   :  { %2826 = vst [vmem:[#allocation19_spill] sm:$0xff] %v2479_v21  ;;  %v1738_v60 = vpop.eup %1737  ;;  %v2483_v38 = vadd.f32 %v1179_v9, %v1009_v18 }
 0x330   :  { %1747 = vpow2.f32 %v1142_v39  ;;  %v1144_v3 = vmul.f32 1.442695, %v1738_v60  ;;  %v1042_v29 = vpop.f32.mrb[56].mxu0  ;;  %1336 = vadd.xlane.f32.xlu1 %v1738_v60  ;;  %v1019_v60 = vadd.f32 %v2449_v22, %v2331_v23  ;;  %v1025_v22 = vadd.f32 %v2458_v8, %v2331_v23 }
 0x331   :  { %2827 = vst [vmem:[#allocation20_spill] sm:$0xff] %v2483_v38  ;;  %v1043_v61 = vadd.f32 %v1042_v29, %v2315_v46  ;;  %v2486_v32 = vpop.f32.mrb[57].mxu0  ;;  %v1794_v29 = vld [vmem:[#allocation2 + $0xb8] sm:$0xff] }
 0x332   :  { %v1740_v44 = vpop.eup %1739  ;;  %1749 = vpow2.f32 %v1144_v3  ;;  %v1046_v51 = vpop.f32.mrb[58].mxu0 }
 0x333   :  { %v1180_v47 = vmul.f32 %v1793_v15, %v1740_v44  ;;  %1751 = vtanh.f32 %v1043_v61  ;;  %v1047_v30 = vadd.f32 %v1046_v51, %v2315_v46  ;;  %v2491_v18 = vpop.f32.mrb[59].mxu0 }
 0x334   :  { %v1742_v39 = vpop.eup %1741 }
 0x335   :  { %v1744_v43 = vpop.eup %1743  ;;  %v2493_v9 = vadd.f32 %v1180_v47, %v1015_v19  ;;  %v1181_v3 = vmul.f32 %v1794_v29, %v1742_v39  ;;  %1753 = vtanh.f32 %v1047_v30  ;;  %v1795_v39 = vld [vmem:[#allocation2 + $0xc0] sm:$0xff] }
 0x336   :  { %v1146_v38 = vmul.f32 1.442695, %v1744_v43  ;;  %1338 = vadd.xlane.f32.xlu0 %v1744_v43 }
 0x337   :  { %2828 = vst [vmem:[#allocation21_spill] sm:$0xff] %v2493_v9  ;;  %v1746_v16 = vpop.eup %1745  ;;  %v2497_v21 = vadd.f32 %v1181_v3, %v1019_v60 }
 0x338   :  { %1755 = vpow2.f32 %v1146_v38  ;;  %v1148_v61 = vmul.f32 1.442695, %v1746_v16  ;;  %v1052_v44 = vpop.f32.mrb[60].mxu0  ;;  %1340 = vadd.xlane.f32.xlu1 %v1746_v16  ;;  %v1029_v16 = vadd.f32 %v2463_v33, %v2331_v23 }
 0x339   :  { %2829 = vst [vmem:[#allocation22_spill] sm:$0xff] %v2497_v21  ;;  %v1053_v51 = vadd.f32 %v1052_v44, %v2315_v46  ;;  %v1054_v15 = vpop.f32.mrb[61].mxu0  ;;  %v1796_v44 = vld [vmem:[#allocation2 + $0xc8] sm:$0xff] }
 0x33a   :  { %v1748_v19 = vpop.eup %1747  ;;  %1757 = vpow2.f32 %v1148_v61  ;;  %v1056_v47 = vpop.f32.mrb[62].mxu0 }
 0x33b   :  { %v1182_v30 = vmul.f32 %v1795_v39, %v1748_v19  ;;  %1759 = vtanh.f32 %v1053_v51  ;;  %v1057_v43 = vadd.f32 %v1056_v47, %v2315_v46  ;;  %v1058_v60 = vpop.f32.mrb[63].mxu0  ;;  %v1035_v19 = vadd.f32 %v2472_v42, %v2331_v23  ;;  %v1797_v47 = vld [vmem:[#allocation2 + $0xd0] sm:$0xff] }
 0x33c   :  { %v1750_v29 = vpop.eup %1749 }
 0x33d   :  { %v1752_v38 = vpop.eup %1751  ;;  %v2503_v3 = vadd.f32 %v1182_v30, %v1025_v22  ;;  %v1183_v21 = vmul.f32 %v1796_v44, %v1750_v29  ;;  %1761 = vtanh.f32 %v1057_v43  ;;  %v1039_v43 = vadd.f32 %v2477_v17, %v2331_v23  ;;  %v1798_v29 = vld [vmem:[#allocation2 + $0xd8] sm:$0xff] }
 0x33e   :  { %v1150_v61 = vmul.f32 1.442695, %v1752_v38  ;;  %1342 = vadd.xlane.f32.xlu0 %v1752_v38  ;;  %v1049_v17 = vadd.f32 %v2491_v18, %v2331_v23  ;;  %v2831_v18 = vlaneseq }
 0x33f   :  { %v1754_v9 = vpop.eup %1753  ;;  %v2507_v8 = vadd.f32 %v1183_v21, %v1029_v16 }
 0x340   :  { %1763 = vpow2.f32 %v1150_v61  ;;  %v1152_v51 = vmul.f32 1.442695, %v1754_v9  ;;  %1344 = vadd.xlane.f32.xlu1 %v1754_v9  ;;  %v1045_v61 = vadd.f32 %v2486_v32, %v2331_v23 }
 0x342   :  { %v1756_v46 = vpop.eup %1755  ;;  %1765 = vpow2.f32 %v1152_v51  ;;  %v1799_v51 = vld [vmem:[#allocation2 + $0xe0] sm:$0xff] }
 0x343   :  { %v1184_v22 = vmul.f32 %v1797_v47, %v1756_v46 }
 0x344   :  { %v1758_v39 = vpop.eup %1757 }
 0x345   :  { %v1760_v33 = vpop.eup %1759  ;;  %v2511_v30 = vadd.f32 %v1184_v22, %v1035_v19  ;;  %v1185_v21 = vmul.f32 %v1798_v29, %v1758_v39  ;;  %v1800_v22 = vld [vmem:[#allocation2 + $0xe8] sm:$0xff]  ;;  %v1801_v29 = vld [vmem:[#allocation3] ss:$0 sm:$0xff] }
 0x346   :  { %v1154_v38 = vmul.f32 1.442695, %v1760_v33  ;;  %1346 = vadd.xlane.f32.xlu0 %v1760_v33 }
 0x347   :  { %v1762_v16 = vpop.eup %1761  ;;  %v2515_v9 = vadd.f32 %v1185_v21, %v1039_v43  ;;  %v2525_v21 = vsub.f32 1.0, %v1801_v29 }
 0x348   :  { %1767 = vpow2.f32 %v1154_v38  ;;  %v1156_v44 = vmul.f32 1.442695, %v1762_v16  ;;  %1348 = vadd.xlane.f32.xlu1 %v1762_v16  ;;  %v1055_v38 = vadd.f32 %v1054_v15, %v2331_v23  ;;  %v1802_v16 = vld [vmem:[#allocation2 + $0xf0] sm:$0xff] }
 0x349   :  { %v1223_v15 = vmul.f32 %v2343_v28, %v2525_v21 }
 0x34a   :  { %v1764_v42 = vpop.eup %1763  ;;  %1769 = vpow2.f32 %v1156_v44 }
 0x34b   :  { %v1186_v46 = vmul.f32 %v1799_v51, %v1764_v42  ;;  %v1803_v51 = vld [vmem:[#allocation2 + $0xf8] sm:$0xff] }
 0x34c   :  { %v1766_v19 = vpop.eup %1765 }
 0x34d   :  { %v2519_v47 = vadd.f32 %v1186_v46, %v1045_v61  ;;  %v1187_v39 = vmul.f32 %v1800_v22, %v1766_v19  ;;  %v1059_v61 = vadd.f32 %v1058_v60, %v2331_v23  ;;  %v1222_v19 = vmul.f32 %v2340_v57, %v2525_v21 }
 0x34e   :  { %v1224_v57 = vmul.f32 %v2353_v55, %v2525_v21  ;;  %v1255_v60 = vadd.f32 %v1223_v15, %v1992_v35  ;;  %v1226_v35 = vmul.f32 %v2367_v41, %v2525_v21 }
 0x34f   :  { %2830 = vst [vmem:[#allocation23_spill] sm:$0xff] %v2519_v47  ;;  %v2523_v33 = vadd.f32 %v1187_v39, %v1049_v17  ;;  %v2532_v47 = vand.u32 127, %v2831_v18  ;;  %v1254_v22 = vadd.f32 %v1222_v19, %v1989_v34  ;;  %v1225_v34 = vmul.f32 %v2357_v59, %v2525_v21 }
 0x350   :  { %v1256_v28 = vadd.f32 %v1224_v57, %v2021_v48  ;;  %v1258_v59 = vadd.f32 %v1226_v35, %v2039_v53  ;;  %v1229_v53 = vmul.f32 %v2385_v6, %v2525_v21 }
 0x351   :  { %vm1352_vm1 = vcmp.eq.s32.totalorder %v2532_v47, 2  ;;  %v1257_v55 = vadd.f32 %v1225_v34, %v2024_v49 }
 0x352   :  { %v1768_v43 = vpop.eup %1767  ;;  %v1261_v15 = vadd.f32 %v1229_v53, %v2061_v0  ;;  %v2832_v53 = vld [vmem:[#allocation6_spill] sm:$0xff] }
 0x353   :  { %v1188_v32 = vmul.f32 %v1802_v16, %v1768_v43 }
 0x354   :  { %v1770_v44 = vpop.eup %1769 }
 0x355   :  { %v2528_v42 = vadd.f32 %v1188_v32, %v1055_v38  ;;  %v1189_v46 = vmul.f32 %v1803_v51, %v1770_v44  ;;  %v1227_v44 = vmul.f32 %v2371_v36, %v2525_v21  ;;  %v1228_v36 = vmul.f32 %v2381_v56, %v2525_v21 }
 0x357   :  { %v2536_v17 = vadd.f32 %v1189_v46, %v1059_v61  ;;  %v1259_v41 = vadd.f32 %v1227_v44, %v2042_v54  ;;  %v1260_v54 = vadd.f32 %v1228_v36, %v2058_v63  ;;  %v1231_v63 = vmul.f32 %v2399_v10, %v2525_v21 }
 0x359   :  { %v1263_v57 = vadd.f32 %v1231_v63, %v2067_v2 }
 0x35b   :  { %v1287_v39 = vpop.xlane.xlu0 %1286 }
 0x35c   :  { %v1355_v23 = vsel %vm1352_vm1, %v1287_v39, %v1254_v22  ;;  %v1230_v22 = vmul.f32 %v2395_v5, %v2525_v21 }
 0x35d   :  { %1387 = vst [vmem:[%s2798_s5] sm:$0xff] %v1355_v23 }
 0x35e   :  { %v1262_v0 = vadd.f32 %v1230_v22, %v2064_v1  ;;  %v1233_v1 = vmul.f32 %v2413_v4, %v2525_v21 }
 0x35f   :  { %v1289_v43 = vpop.xlane.xlu0 %1288 }
 0x360   :  { %v1356_v29 = vsel %vm1352_vm1, %v1289_v43, %v1255_v60  ;;  %v1232_v60 = vmul.f32 %v2409_v7, %v2525_v21  ;;  %v1265_v34 = vadd.f32 %v1233_v1, %v2083_v12 }
 0x361   :  { %1388 = vst [vmem:[%s2798_s5 + $0x8] sm:$0xff] %v1356_v29 }
 0x362   :  { %v1264_v2 = vadd.f32 %v1232_v60, %v2080_v11  ;;  %v1235_v11 = vmul.f32 %v2427_v62, %v2525_v21 }
 0x363   :  { %v1291_v38 = vpop.xlane.xlu1 %1290 }
 0x364   :  { %v1357_v16 = vsel %vm1352_vm1, %v1291_v38, %v1256_v28  ;;  %v1234_v28 = vmul.f32 %v2423_v45, %v2525_v21  ;;  %v1267_v35 = vadd.f32 %v1235_v11, %v2089_v14  ;;  %v1246_v11 = vmul.f32 %v2503_v3, %v2525_v21 }
 0x365   :  { %1389 = vst [vmem:[%s2798_s5 + $0x10] sm:$0xff] %v1357_v16 }
 0x366   :  { %v1266_v12 = vadd.f32 %v1234_v28, %v2086_v13  ;;  %v1237_v13 = vmul.f32 %v2441_v52, %v2525_v21 }
 0x367   :  { %v1293_v32 = vpop.xlane.xlu1 %1292 }
 0x368   :  { %v1358_v48 = vsel %vm1352_vm1, %v1293_v32, %v1257_v55  ;;  %v1236_v55 = vmul.f32 %v2437_v31, %v2525_v21 }
 0x369   :  { %1390 = vst [vmem:[%s2798_s5 + $0x18] sm:$0xff] %v1358_v48  ;;  %v1269_v48 = vadd.f32 %v1237_v13, %v2105_v25 }
 0x36a   :  { %v1268_v14 = vadd.f32 %v1236_v55, %v2102_v24  ;;  %v1239_v24 = vmul.f32 %v2455_v50, %v2525_v21 }
 0x36b   :  { %v1295_v61 = vpop.xlane.xlu0 %1294 }
 0x36c   :  { %v1359_v51 = vsel %vm1352_vm1, %v1295_v61, %v1258_v59  ;;  %v1238_v59 = vmul.f32 %v2451_v20, %v2525_v21 }
 0x36d   :  { %1391 = vst [vmem:[%s2798_s5 + $0x20] sm:$0xff] %v1359_v51  ;;  %v1297_v49 = vpop.xlane.xlu1 %1296 }
 0x36e   :  { %v1360_v46 = vsel %vm1352_vm1, %v1297_v49, %v1259_v41  ;;  %v1270_v25 = vadd.f32 %v1238_v59, %v2108_v26  ;;  %v1271_v41 = vadd.f32 %v1239_v24, %v2111_v27  ;;  %v1240_v49 = vmul.f32 %v2465_v58, %v2525_v21 }
 0x36f   :  { %1392 = vst [vmem:[%s2798_s5 + $0x28] sm:$0xff] %v1360_v46  ;;  %v1241_v26 = vmul.f32 %v2469_v40, %v2525_v21 }
 0x370   :  { %v1272_v27 = vadd.f32 %v1240_v49, %v2121_v37  ;;  %v2834_v37 = vld [vmem:[#allocation20_spill] sm:$0xff] }
 0x371   :  { %v1243_v40 = vmul.f32 %v2834_v37, %v2525_v21 }
 0x373   :  { %v1299_v18 = vpop.xlane.xlu0 %1298 }
 0x374   :  { %v1361_v19 = vsel %vm1352_vm1, %v1299_v18, %v1260_v54  ;;  %v1273_v54 = vadd.f32 %v1241_v26, %v2832_v53  ;;  %v2833_v18 = vld [vmem:[#allocation19_spill] sm:$0xff]  ;;  %v2847_v26 = vld [vmem:[#allocation16_spill] sm:$0xff] }
 0x375   :  { %1393 = vst [vmem:[%s2798_s5 + $0x30] sm:$0xff] %v1361_v19  ;;  %v1301_v56 = vpop.xlane.xlu1 %1300  ;;  %v1242_v19 = vmul.f32 %v2833_v18, %v2525_v21 }
 0x376   :  { %v1362_v39 = vsel %vm1352_vm1, %v1301_v56, %v1261_v15  ;;  %v2835_v56 = vld [vmem:[#allocation7_spill] sm:$0xff] }
 0x377   :  { %1394 = vst [vmem:[%s2798_s5 + $0x38] sm:$0xff] %v1362_v39  ;;  %v1274_v22 = vadd.f32 %v1242_v19, %v2835_v56 }
 0x37b   :  { %v1303_v6 = vpop.xlane.xlu0 %1302 }
 0x37c   :  { %v1363_v23 = vsel %vm1352_vm1, %v1303_v6, %v1262_v0  ;;  %v2836_v0 = vld [vmem:[#allocation8_spill] sm:$0xff] }
 0x37d   :  { %1395 = vst [vmem:[%s2798_s5 + $0x40] sm:$0xff] %v1363_v23  ;;  %v1305_v5 = vpop.xlane.xlu1 %1304  ;;  %v1275_v6 = vadd.f32 %v1243_v40, %v2836_v0 }
 0x37e   :  { %v1364_v43 = vsel %vm1352_vm1, %v1305_v5, %v1263_v57  ;;  %v2837_v57 = vld [vmem:[#allocation21_spill] sm:$0xff] }
 0x37f   :  { %1396 = vst [vmem:[%s2798_s5 + $0x48] sm:$0xff] %v1364_v43  ;;  %v1244_v5 = vmul.f32 %v2837_v57, %v2525_v21  ;;  %v2838_v43 = vld [vmem:[#allocation22_spill] sm:$0xff] }
 0x380   :  { %v1245_v1 = vmul.f32 %v2838_v43, %v2525_v21 }
 0x383   :  { %v1307_v10 = vpop.xlane.xlu0 %1306 }
 0x384   :  { %v1365_v29 = vsel %vm1352_vm1, %v1307_v10, %v1264_v2  ;;  %v2839_v2 = vld [vmem:[#allocation9_spill] sm:$0xff] }
 0x385   :  { %1397 = vst [vmem:[%s2798_s5 + $0x50] sm:$0xff] %v1365_v29  ;;  %v1309_v7 = vpop.xlane.xlu1 %1308  ;;  %v1276_v10 = vadd.f32 %v1244_v5, %v2839_v2 }
 0x386   :  { %v1366_v38 = vsel %vm1352_vm1, %v1309_v7, %v1265_v34  ;;  %v2840_v7 = vld [vmem:[#allocation10_spill] sm:$0xff] }
 0x387   :  { %1398 = vst [vmem:[%s2798_s5 + $0x58] sm:$0xff] %v1366_v38  ;;  %v1277_v28 = vadd.f32 %v1245_v1, %v2840_v7 }
 0x38b   :  { %v1311_v4 = vpop.xlane.xlu0 %1310 }
 0x38c   :  { %v1367_v16 = vsel %vm1352_vm1, %v1311_v4, %v1266_v12  ;;  %v1247_v4 = vmul.f32 %v2507_v8, %v2525_v21  ;;  %v1249_v8 = vmul.f32 %v2515_v9, %v2525_v21  ;;  %v1251_v9 = vmul.f32 %v2523_v33, %v2525_v21 }
 0x38d   :  { %1399 = vst [vmem:[%s2798_s5 + $0x60] sm:$0xff] %v1367_v16  ;;  %v1313_v45 = vpop.xlane.xlu1 %1312  ;;  %v2841_v16 = vld [vmem:[#allocation11_spill] sm:$0xff]  ;;  %v1253_v33 = vmul.f32 %v2536_v17, %v2525_v21 }
 0x38e   :  { %v1368_v32 = vsel %vm1352_vm1, %v1313_v45, %v1267_v35  ;;  %v1278_v35 = vadd.f32 %v1246_v11, %v2841_v16 }
 0x38f   :  { %1400 = vst [vmem:[%s2798_s5 + $0x68] sm:$0xff] %v1368_v32  ;;  %v2842_v32 = vld [vmem:[#allocation12_spill] sm:$0xff] }
 0x390   :  { %v1279_v13 = vadd.f32 %v1247_v4, %v2842_v32 }
 0x393   :  { %v1315_v62 = vpop.xlane.xlu0 %1314 }
 0x394   :  { %v1369_v44 = vsel %vm1352_vm1, %v1315_v62, %v1268_v14  ;;  %v1248_v14 = vmul.f32 %v2511_v30, %v2525_v21 }
 0x395   :  { %1401 = vst [vmem:[%s2798_s5 + $0x70] sm:$0xff] %v1369_v44  ;;  %v1317_v31 = vpop.xlane.xlu1 %1316  ;;  %v2843_v44 = vld [vmem:[#allocation13_spill] sm:$0xff] }
 0x396   :  { %v1370_v61 = vsel %vm1352_vm1, %v1317_v31, %v1269_v48  ;;  %v1280_v48 = vadd.f32 %v1248_v14, %v2843_v44 }
 0x397   :  { %1402 = vst [vmem:[%s2798_s5 + $0x78] sm:$0xff] %v1370_v61  ;;  %v2844_v61 = vld [vmem:[#allocation14_spill] sm:$0xff] }
 0x398   :  { %v1281_v24 = vadd.f32 %v1249_v8, %v2844_v61 }
 0x39b   :  { %v1319_v52 = vpop.xlane.xlu0 %1318 }
 0x39c   :  { %v1371_v51 = vsel %vm1352_vm1, %v1319_v52, %v1270_v25  ;;  %v2845_v25 = vld [vmem:[#allocation23_spill] sm:$0xff] }
 0x39d   :  { %1403 = vst [vmem:[%s2798_s5 + $0x80] sm:$0xff] %v1371_v51  ;;  %v1321_v20 = vpop.xlane.xlu1 %1320  ;;  %v1250_v52 = vmul.f32 %v2845_v25, %v2525_v21 }
 0x39e   :  { %v1372_v36 = vsel %vm1352_vm1, %v1321_v20, %v1271_v41  ;;  %v2846_v41 = vld [vmem:[#allocation15_spill] sm:$0xff] }
 0x39f   :  { %1404 = vst [vmem:[%s2798_s5 + $0x88] sm:$0xff] %v1372_v36  ;;  %v1282_v20 = vadd.f32 %v1250_v52, %v2846_v41 }
 0x3a3   :  { %v1323_v50 = vpop.xlane.xlu0 %1322 }
 0x3a4   :  { %v1373_v46 = vsel %vm1352_vm1, %v1323_v50, %v1272_v27  ;;  %v1283_v27 = vadd.f32 %v1251_v9, %v2847_v26 }
 0x3a5   :  { %1405 = vst [vmem:[%s2798_s5 + $0x90] sm:$0xff] %v1373_v46  ;;  %v1325_v58 = vpop.xlane.xlu1 %1324  ;;  %v1252_v46 = vmul.f32 %v2528_v42, %v2525_v21 }
 0x3a6   :  { %v1374_v15 = vsel %vm1352_vm1, %v1325_v58, %v1273_v54  ;;  %v2848_v54 = vld [vmem:[#allocation17_spill] sm:$0xff] }
 0x3a7   :  { %1406 = vst [vmem:[%s2798_s5 + $0x98] sm:$0xff] %v1374_v15  ;;  %v1284_v58 = vadd.f32 %v1252_v46, %v2848_v54  ;;  %v2849_v15 = vld [vmem:[#allocation18_spill] sm:$0xff] }
 0x3a8   :  { %v1285_v37 = vadd.f32 %v1253_v33, %v2849_v15 }
 0x3ab   :  { %v1327_v39 = vpop.xlane.xlu0 %1326 }
 0x3ac   :  { %v1375_v63 = vsel %vm1352_vm1, %v1327_v39, %v1274_v22 }
 0x3ad   :  { %1407 = vst [vmem:[%s2798_s5 + $0xa0] sm:$0xff] %v1375_v63  ;;  %v1329_v23 = vpop.xlane.xlu1 %1328 }
 0x3ae   :  { %v1376_v60 = vsel %vm1352_vm1, %v1329_v23, %v1275_v6 }
 0x3af   :  { %1408 = vst [vmem:[%s2798_s5 + $0xa8] sm:$0xff] %v1376_v60 }
 0x3b3   :  { %v1331_v29 = vpop.xlane.xlu0 %1330 }
 0x3b4   :  { %v1377_v34 = vsel %vm1352_vm1, %v1331_v29, %v1276_v10 }
 0x3b5   :  { %1409 = vst [vmem:[%s2798_s5 + $0xb0] sm:$0xff] %v1377_v34  ;;  %v1333_v38 = vpop.xlane.xlu1 %1332 }
 0x3b6   :  { %v1378_v12 = vsel %vm1352_vm1, %v1333_v38, %v1277_v28 }
 0x3b7   :  { %1410 = vst [vmem:[%s2798_s5 + $0xb8] sm:$0xff] %v1378_v12 }
 0x3bb   :  { %v1335_v45 = vpop.xlane.xlu0 %1334 }
 0x3bc   :  { %v1379_v55 = vsel %vm1352_vm1, %v1335_v45, %v1278_v35 }
 0x3bd   :  { %1411 = vst [vmem:[%s2798_s5 + $0xc0] sm:$0xff] %v1379_v55  ;;  %v1337_v3 = vpop.xlane.xlu1 %1336 }
 0x3be   :  { %v1380_v62 = vsel %vm1352_vm1, %v1337_v3, %v1279_v13 }
 0x3bf   :  { %1412 = vst [vmem:[%s2798_s5 + $0xc8] sm:$0xff] %v1380_v62 }
 0x3c3   :  { %v1339_v31 = vpop.xlane.xlu0 %1338 }
 0x3c4   :  { %v1381_v59 = vsel %vm1352_vm1, %v1339_v31, %v1280_v48 }
 0x3c5   :  { %1413 = vst [vmem:[%s2798_s5 + $0xd0] sm:$0xff] %v1381_v59  ;;  %v1341_v30 = vpop.xlane.xlu1 %1340 }
 0x3c6   :  { %v1382_v51 = vsel %vm1352_vm1, %v1341_v30, %v1281_v24 }
 0x3c7   :  { %1414 = vst [vmem:[%s2798_s5 + $0xd8] sm:$0xff] %v1382_v51 }
 0x3cb   :  { %v1343_v49 = vpop.xlane.xlu0 %1342 }
 0x3cc   :  { %v1383_v36 = vsel %vm1352_vm1, %v1343_v49, %v1282_v20 }
 0x3cd   :  { %1415 = vst [vmem:[%s2798_s5 + $0xe0] sm:$0xff] %v1383_v36  ;;  %v1345_v50 = vpop.xlane.xlu1 %1344 }
 0x3ce   :  { %v1384_v53 = vsel %vm1352_vm1, %v1345_v50, %v1283_v27 }
 0x3cf   :  { %1416 = vst [vmem:[%s2798_s5 + $0xe8] sm:$0xff] %v1384_v53 }
 0x3d3   :  { %v1347_v18 = vpop.xlane.xlu0 %1346 }
 0x3d4   :  { %v1385_v19 = vsel %vm1352_vm1, %v1347_v18, %v1284_v58 }
 0x3d5   :  { %1417 = vst [vmem:[%s2798_s5 + $0xf0] sm:$0xff] %v1385_v19  ;;  %v1349_v42 = vpop.xlane.xlu1 %1348 }
 0x3d6   :  { %v1386_v40 = vsel %vm1352_vm1, %v1349_v42, %v1285_v37 }
 0x3d7   :  { %1418 = vst [vmem:[%s2798_s5 + $0xf8] sm:$0xff] %v1386_v40 }
 0x3d8   :  { %1423 = vsyncpa [#allocation4], 1 }

</bundles_post_ra>
